<compile_context>
chip_gen: v7x
topology: tpu7x:2x2x1
jax: 0.10.0
libtpu: 0.0.40
codegen_flags: <defaults>
</compile_context>

<pallas_src>
import functools

import jax
import jax.numpy as jnp
from jax import lax
from jax.experimental import pallas as pl
from jax.experimental.pallas import tpu as pltpu


def _eup_supports_bf16():
    """True on chips whose EUP/VPU have a bf16 path (v6e / v7x); False on v5-."""
    try:
        kind = jax.devices()[0].device_kind.lower()
    except Exception:
        return False
    return not any(f"v{g}" in kind for g in (2, 3, 4, 5))


def fcnn_kernel(x_ref,
                w1_ref, b1_ref,
                w2_ref, b2_ref,
                w3_ref, b3_ref,
                w4_ref, b4_ref,
                w5_ref, b5_ref,
                oT_ref, *, tanh_dtype):
    """Fused 5-layer MLP with the batch on the lane axis.

      x   : [bt, in_dim]        compute dtype (natural layout; transpose folded
                                into the first matmul)
      Wk  : [fan_out, fan_in]   compute dtype (PyTorch nn.Linear layout)
      bk  : [fan_out, 1]        f32 (per-sublane constant, broadcast over lanes)
      oT  : [out_dim, bt]       lane-dense store
    """
    cdt = w1_ref.dtype                       # MXU input dtype
    f32 = jnp.float32
    tanh_in_f32 = jnp.dtype(tanh_dtype) == jnp.dtype(f32)

    def act(z):                              # z: f32 [fan_out, bt]
        if tanh_in_f32:
            return jnp.tanh(z).astype(cdt)
        # v6e/v7x: tanh on the EUP in bf16 (halves EUP slot occupancy).
        return jnp.tanh(z.astype(tanh_dtype)).astype(cdt)

    # Layer 1: contract the last axes of W1 [hidden, in] and x [bt, in]
    # (== W1 @ x^T). Keeps activations in [fan_out, bt] layout from here on.
    z1 = lax.dot_general(w1_ref[...], x_ref[...],
                         (((1,), (1,)), ((), ())),
                         preferred_element_type=f32) + b1_ref[...]
    h = act(z1)
    h = act(jnp.dot(w2_ref[...], h, preferred_element_type=f32) + b2_ref[...])
    h = act(jnp.dot(w3_ref[...], h, preferred_element_type=f32) + b3_ref[...])
    h = act(jnp.dot(w4_ref[...], h, preferred_element_type=f32) + b4_ref[...])
    out = jnp.dot(w5_ref[...], h, preferred_element_type=f32) + b5_ref[...]

    oT_ref[...] = out.astype(oT_ref.dtype)


def _pick_batch_tile(B, requested, min_blocks):
    """Multiple of 128; as large as useful; keeps >= min_blocks grid steps when
    the batch is big enough (v7x megacore)."""
    def rup(v, m):
        return ((v + m - 1) // m) * m
    bt = min(int(requested), rup(max(int(B), 1), 128))
    if min_blocks > 1 and B >= min_blocks * 128:
        bt = min(bt, rup(pl.cdiv(B, min_blocks), 128))
    return max(128, (bt // 128) * 128)


@functools.partial(
    jax.jit,
    static_argnames=("batch_tile", "compute_dtype", "tanh_dtype",
                     "min_blocks", "transposed_output"))
def _fcnn_forward_impl(x, params, *, batch_tile, compute_dtype, tanh_dtype,
                       min_blocks, transposed_output):
    B, in_dim = x.shape
    out_dim = params[-1][0].shape[0]

    bt = _pick_batch_tile(B, batch_tile, min_blocks)
    n_blocks = pl.cdiv(B, bt)
    Bp = n_blocks * bt

    xc = x.astype(compute_dtype)              # no-op for the f32 path
    if Bp != B:
        # Tail pad in natural layout; only materializes when the batch is
        # ragged w.r.t. the tile.
        xc = jnp.pad(xc, ((0, Bp - B), (0, 0)))

    flat = []
    in_specs = [pl.BlockSpec((bt, in_dim), lambda i: (i, 0))]
    flops = 0
    transcendentals = 0
    weight_bytes = 0
    n_layers = len(params)
    for li, (w, b) in enumerate(params):
        wc = w.astype(compute_dtype)                    # [fan_out, fan_in]
        bc = b.reshape(-1, 1).astype(jnp.float32)       # [fan_out, 1]
        flat.append(wc)
        flat.append(bc)
        # Constant block index -> resident in VMEM, no per-step re-DMA.
        # (If hidden_dim is ever scaled into the thousands, revisit the
        #  resident-weight VMEM budget, v7x has 64 MiB/TC.)
        in_specs.append(pl.BlockSpec(wc.shape, lambda i: (0, 0)))
        in_specs.append(pl.BlockSpec(bc.shape, lambda i: (0, 0)))
        fo, fi = w.shape
        flops += 2 * Bp * fo * fi
        if li < n_layers - 1:
            transcendentals += Bp * fo
        weight_bytes += wc.size * jnp.dtype(compute_dtype).itemsize + bc.size * 4

    bytes_accessed = (Bp * in_dim * jnp.dtype(compute_dtype).itemsize
                      + Bp * out_dim * jnp.dtype(x.dtype).itemsize
                      + weight_bytes)

    outT = pl.pallas_call(
        functools.partial(fcnn_kernel, tanh_dtype=tanh_dtype),
        out_shape=jax.ShapeDtypeStruct((out_dim, Bp), x.dtype),
        grid_spec=pltpu.PrefetchScalarGridSpec(
            num_scalar_prefetch=0,
            grid=(n_blocks,),
            in_specs=in_specs,
            out_specs=pl.BlockSpec((out_dim, bt), lambda i: (0, i)),
        ),
        compiler_params=pltpu.CompilerParams(
            dimension_semantics=("parallel",),
            vmem_limit_bytes=32 * 1024 * 1024,
        ),
        cost_estimate=pl.CostEstimate(
            flops=int(flops),
            transcendentals=int(transcendentals),
            bytes_accessed=int(bytes_accessed)),
    )(xc, *flat)

    if transposed_output:
        # Lane-dense [out_dim, B]; preferred when the consumer can take it.
        return outT[:, :B]
    # PyTorch forward semantics: [B, out_dim].
    return outT[:, :B].T


def fcnn_forward(x, params, *, batch_tile=2048, compute_dtype=jnp.bfloat16,
                 low_precision_tanh=None, min_blocks=2, transposed_output=False):
    """x: [B, in_dim]; params: list of (W [out, in], b [out]) per layer
    (PyTorch nn.Linear layout). Returns [B, out_dim] (or [out_dim, B] when
    transposed_output=True)."""
    if jnp.dtype(compute_dtype) == jnp.dtype(jnp.float32):
        tanh_dtype = jnp.float32
    else:
        if low_precision_tanh is None:
            low_precision_tanh = _eup_supports_bf16()
        tanh_dtype = compute_dtype if low_precision_tanh else jnp.float32
    return _fcnn_forward_impl(
        x, tuple((w, b) for (w, b) in params),
        batch_tile=int(batch_tile), compute_dtype=compute_dtype,
        tanh_dtype=tanh_dtype, min_blocks=int(min_blocks),
        transposed_output=bool(transposed_output))


def init_fcnn_params(key, in_dim, out_dim, hidden_dim, dtype=jnp.float32):
    """nn.Linear default init U(-1/sqrt(fan_in), +1/sqrt(fan_in)).
    Weights kept in PyTorch-native [out_features, in_features] layout."""
    dims = [(in_dim, hidden_dim),
            (hidden_dim, hidden_dim),
            (hidden_dim, hidden_dim),
            (hidden_dim, hidden_dim),
            (hidden_dim, out_dim)]
    params = []
    for (fan_in, fan_out) in dims:
        key, kw, kb = jax.random.split(key, 3)
        bound = float(fan_in) ** -0.5
        w = jax.random.uniform(kw, (fan_out, fan_in), dtype=dtype,
                               minval=-bound, maxval=bound)
        b = jax.random.uniform(kb, (fan_out,), dtype=dtype,
                               minval=-bound, maxval=bound)
        params.append((w, b))
    return params


def fcnn_reference(x, params, compute_dtype=jnp.float32, tanh_dtype=None):
    """Pure-JAX reference. With compute_dtype / tanh_dtype matching the kernel
    it mirrors the kernel's numerics; with f32 it is the module's semantics."""
    if tanh_dtype is None:
        tanh_dtype = jnp.float32
    h = x
    n = len(params)
    for i, (w, b) in enumerate(params):
        z = jnp.dot(h.astype(compute_dtype), w.T.astype(compute_dtype),
                    preferred_element_type=jnp.float32) + b.astype(jnp.float32)
        if i < n - 1:
            h = jnp.tanh(z.astype(tanh_dtype)).astype(jnp.float32)
        else:
            h = z
    return h.astype(x.dtype)


if __name__ == "__main__":
    key = jax.random.PRNGKey(0)
    in_dim, out_dim, hidden_dim = 4, 4, 32
    batch = 2048          # -> 2 parallel grid steps of batch_tile=1024

    kx, kp = jax.random.split(key)
    x = jax.random.normal(kx, (batch, in_dim), dtype=jnp.float32)
    params = init_fcnn_params(kp, in_dim, out_dim, hidden_dim)

    use_bf16_tanh = _eup_supports_bf16()
    tanh_dtype = jnp.bfloat16 if use_bf16_tanh else jnp.float32

    # Fast path: bf16 MXU inputs, f32 accumulate; tanh in bf16 where supported.
    out = fcnn_forward(x, params, batch_tile=2048, compute_dtype=jnp.bfloat16,
                       low_precision_tanh=use_bf16_tanh)
    out = jax.block_until_ready(out)
    assert out.shape == (batch, out_dim)

    # Tight check against a pure-JAX reference with matching numerics.
    ref_matched = fcnn_reference(x, params, compute_dtype=jnp.bfloat16,
                                 tanh_dtype=tanh_dtype)
    err = float(jnp.max(jnp.abs(out - ref_matched)))
    # EUP bf16 tanh may differ from XLA's tanh by a couple of bf16 ulps.
    tol = 2.5e-2 if use_bf16_tanh else 5e-3
    assert err < tol, f"bf16 path vs matched reference: max abs err {err} (tol {tol})"

    # Loose sanity check against the full-f32 module semantics.
    ref_f32 = fcnn_reference(x, params, compute_dtype=jnp.float32)
    err_f32 = float(jnp.max(jnp.abs(out - ref_f32)))
    assert err_f32 < 1e-1, f"bf16 path vs f32 reference: max abs err {err_f32}"

    # Strict-parity path: full f32 compute in the kernel (matches nn.Linear
    # semantics up to TPU matmul rounding).
    out_f32 = fcnn_forward(x, params, batch_tile=2048, compute_dtype=jnp.float32)
    out_f32 = jax.block_until_ready(out_f32)
    err_strict = float(jnp.max(jnp.abs(out_f32 - ref_f32)))
    assert err_strict < 2e-2, f"f32 path vs f32 reference: max abs err {err_strict}"

    print("KERNEL_OK")
</pallas_src>

<mosaic_0001>
module attributes {stable_mosaic.version = 11 : i64} {
  func.func @fcnn_kernel(%arg0: i32, %arg1: memref<1024x4xbf16, #tpu.memory_space<vmem>>, %arg2: memref<32x4xbf16, #tpu.memory_space<vmem>>, %arg3: memref<32x1xf32, #tpu.memory_space<vmem>>, %arg4: memref<32x32xbf16, #tpu.memory_space<vmem>>, %arg5: memref<32x1xf32, #tpu.memory_space<vmem>>, %arg6: memref<32x32xbf16, #tpu.memory_space<vmem>>, %arg7: memref<32x1xf32, #tpu.memory_space<vmem>>, %arg8: memref<32x32xbf16, #tpu.memory_space<vmem>>, %arg9: memref<32x1xf32, #tpu.memory_space<vmem>>, %arg10: memref<4x32xbf16, #tpu.memory_space<vmem>>, %arg11: memref<4x1xf32, #tpu.memory_space<vmem>>, %arg12: memref<4x1024xf32, #tpu.memory_space<vmem>>) attributes {dimension_semantics = [#tpu.dimension_semantics<parallel>], iteration_bounds = array<i64: 2>, scalar_prefetch = 0 : i64, scratch_operands = 0 : i64, tpu.core_type = #tpu.core_type<tc>, window_params = [{transform_indices = @transform_0, window_bounds = array<i64: 1024, 4>}, {pipeline_mode = #tpu.pipeline_mode<synchronous>, transform_indices = @transform_1, window_bounds = array<i64: 32, 4>}, {pipeline_mode = #tpu.pipeline_mode<synchronous>, transform_indices = @transform_2, window_bounds = array<i64: 32, 1>}, {pipeline_mode = #tpu.pipeline_mode<synchronous>, transform_indices = @transform_3, window_bounds = array<i64: 32, 32>}, {pipeline_mode = #tpu.pipeline_mode<synchronous>, transform_indices = @transform_4, window_bounds = array<i64: 32, 1>}, {pipeline_mode = #tpu.pipeline_mode<synchronous>, transform_indices = @transform_5, window_bounds = array<i64: 32, 32>}, {pipeline_mode = #tpu.pipeline_mode<synchronous>, transform_indices = @transform_6, window_bounds = array<i64: 32, 1>}, {pipeline_mode = #tpu.pipeline_mode<synchronous>, transform_indices = @transform_7, window_bounds = array<i64: 32, 32>}, {pipeline_mode = #tpu.pipeline_mode<synchronous>, transform_indices = @transform_8, window_bounds = array<i64: 32, 1>}, {pipeline_mode = #tpu.pipeline_mode<synchronous>, transform_indices = @transform_9, window_bounds = array<i64: 4, 32>}, {pipeline_mode = #tpu.pipeline_mode<synchronous>, transform_indices = @transform_10, window_bounds = array<i64: 4, 1>}, {transform_indices = @transform_11, window_bounds = array<i64: 4, 1024>}]} {
    %c0 = arith.constant 0 : index
    %c0_0 = arith.constant 0 : index
    %0 = vector.load %arg2[%c0, %c0_0] : memref<32x4xbf16, #tpu.memory_space<vmem>>, vector<32x4xbf16>
    %c0_1 = arith.constant 0 : index
    %c0_2 = arith.constant 0 : index
    %1 = vector.load %arg1[%c0_1, %c0_2] : memref<1024x4xbf16, #tpu.memory_space<vmem>>, vector<1024x4xbf16>
    %cst = arith.constant dense<0.000000e+00> : vector<32x1024xf32>
    %2 = tpu.matmul %0, %1, %cst {dimension_numbers = #tpu.dot_dimension_numbers<[1], [1], [0], [0], [0, 0, 1, 0], [], []>} : vector<32x4xbf16>, vector<1024x4xbf16>, vector<32x1024xf32> -> vector<32x1024xf32>
    %c0_3 = arith.constant 0 : index
    %c0_4 = arith.constant 0 : index
    %3 = vector.load %arg3[%c0_3, %c0_4] : memref<32x1xf32, #tpu.memory_space<vmem>>, vector<32x1xf32>
    %4 = vector.broadcast %3 : vector<32x1xf32> to vector<32x1024xf32>
    %5 = arith.addf %2, %4 : vector<32x1024xf32>
    %6 = arith.truncf %5 : vector<32x1024xf32> to vector<32x1024xbf16>
    %7 = math.tanh %6 : vector<32x1024xbf16>
    %c0_5 = arith.constant 0 : index
    %c0_6 = arith.constant 0 : index
    %8 = vector.load %arg4[%c0_5, %c0_6] : memref<32x32xbf16, #tpu.memory_space<vmem>>, vector<32x32xbf16>
    %cst_7 = arith.constant dense<0.000000e+00> : vector<32x1024xf32>
    %9 = tpu.matmul %8, %7, %cst_7 {dimension_numbers = #tpu.dot_dimension_numbers<[1], [0], [0], [1], [0, 0, 1, 1], [], []>} : vector<32x32xbf16>, vector<32x1024xbf16>, vector<32x1024xf32> -> vector<32x1024xf32>
    %c0_8 = arith.constant 0 : index
    %c0_9 = arith.constant 0 : index
    %10 = vector.load %arg5[%c0_8, %c0_9] : memref<32x1xf32, #tpu.memory_space<vmem>>, vector<32x1xf32>
    %11 = vector.broadcast %10 : vector<32x1xf32> to vector<32x1024xf32>
    %12 = arith.addf %9, %11 : vector<32x1024xf32>
    %13 = arith.truncf %12 : vector<32x1024xf32> to vector<32x1024xbf16>
    %14 = math.tanh %13 : vector<32x1024xbf16>
    %c0_10 = arith.constant 0 : index
    %c0_11 = arith.constant 0 : index
    %15 = vector.load %arg6[%c0_10, %c0_11] : memref<32x32xbf16, #tpu.memory_space<vmem>>, vector<32x32xbf16>
    %cst_12 = arith.constant dense<0.000000e+00> : vector<32x1024xf32>
    %16 = tpu.matmul %15, %14, %cst_12 {dimension_numbers = #tpu.dot_dimension_numbers<[1], [0], [0], [1], [0, 0, 1, 1], [], []>} : vector<32x32xbf16>, vector<32x1024xbf16>, vector<32x1024xf32> -> vector<32x1024xf32>
    %c0_13 = arith.constant 0 : index
    %c0_14 = arith.constant 0 : index
    %17 = vector.load %arg7[%c0_13, %c0_14] : memref<32x1xf32, #tpu.memory_space<vmem>>, vector<32x1xf32>
    %18 = vector.broadcast %17 : vector<32x1xf32> to vector<32x1024xf32>
    %19 = arith.addf %16, %18 : vector<32x1024xf32>
    %20 = arith.truncf %19 : vector<32x1024xf32> to vector<32x1024xbf16>
    %21 = math.tanh %20 : vector<32x1024xbf16>
    %c0_15 = arith.constant 0 : index
    %c0_16 = arith.constant 0 : index
    %22 = vector.load %arg8[%c0_15, %c0_16] : memref<32x32xbf16, #tpu.memory_space<vmem>>, vector<32x32xbf16>
    %cst_17 = arith.constant dense<0.000000e+00> : vector<32x1024xf32>
    %23 = tpu.matmul %22, %21, %cst_17 {dimension_numbers = #tpu.dot_dimension_numbers<[1], [0], [0], [1], [0, 0, 1, 1], [], []>} : vector<32x32xbf16>, vector<32x1024xbf16>, vector<32x1024xf32> -> vector<32x1024xf32>
    %c0_18 = arith.constant 0 : index
    %c0_19 = arith.constant 0 : index
    %24 = vector.load %arg9[%c0_18, %c0_19] : memref<32x1xf32, #tpu.memory_space<vmem>>, vector<32x1xf32>
    %25 = vector.broadcast %24 : vector<32x1xf32> to vector<32x1024xf32>
    %26 = arith.addf %23, %25 : vector<32x1024xf32>
    %27 = arith.truncf %26 : vector<32x1024xf32> to vector<32x1024xbf16>
    %28 = math.tanh %27 : vector<32x1024xbf16>
    %c0_20 = arith.constant 0 : index
    %c0_21 = arith.constant 0 : index
    %29 = vector.load %arg10[%c0_20, %c0_21] : memref<4x32xbf16, #tpu.memory_space<vmem>>, vector<4x32xbf16>
    %cst_22 = arith.constant dense<0.000000e+00> : vector<4x1024xf32>
    %30 = tpu.matmul %29, %28, %cst_22 {dimension_numbers = #tpu.dot_dimension_numbers<[1], [0], [0], [1], [0, 0, 1, 1], [], []>} : vector<4x32xbf16>, vector<32x1024xbf16>, vector<4x1024xf32> -> vector<4x1024xf32>
    %c0_23 = arith.constant 0 : index
    %c0_24 = arith.constant 0 : index
    %31 = vector.load %arg11[%c0_23, %c0_24] : memref<4x1xf32, #tpu.memory_space<vmem>>, vector<4x1xf32>
    %32 = vector.broadcast %31 : vector<4x1xf32> to vector<4x1024xf32>
    %33 = arith.addf %30, %32 : vector<4x1024xf32>
    %c0_25 = arith.constant 0 : index
    %c0_26 = arith.constant 0 : index
    %34 = vector.load %arg12[%c0_25, %c0_26] : memref<4x1024xf32, #tpu.memory_space<vmem>>, vector<4x1024xf32>
    tpu.vector_store %arg12[%c0_25, %c0_26], %33 {strides = array<i32>} : memref<4x1024xf32, #tpu.memory_space<vmem>>, vector<4x1024xf32>,
    return
  }
  func.func @transform_0(%arg0: i32) -> (i32, i32) {
    %c0_i32 = arith.constant 0 : i32
    %c0_i32_0 = arith.constant 0 : i32
    return %arg0, %c0_i32 : i32, i32
  }
  func.func @transform_1(%arg0: i32) -> (i32, i32) {
    %c0_i32 = arith.constant 0 : i32
    %c0_i32_0 = arith.constant 0 : i32
    %c0_i32_1 = arith.constant 0 : i32
    return %c0_i32, %c0_i32_0 : i32, i32
  }
  func.func @transform_2(%arg0: i32) -> (i32, i32) {
    %c0_i32 = arith.constant 0 : i32
    %c0_i32_0 = arith.constant 0 : i32
    %c0_i32_1 = arith.constant 0 : i32
    return %c0_i32, %c0_i32_0 : i32, i32
  }
  func.func @transform_3(%arg0: i32) -> (i32, i32) {
    %c0_i32 = arith.constant 0 : i32
    %c0_i32_0 = arith.constant 0 : i32
    %c0_i32_1 = arith.constant 0 : i32
    return %c0_i32, %c0_i32_0 : i32, i32
  }
  func.func @transform_4(%arg0: i32) -> (i32, i32) {
    %c0_i32 = arith.constant 0 : i32
    %c0_i32_0 = arith.constant 0 : i32
    %c0_i32_1 = arith.constant 0 : i32
    return %c0_i32, %c0_i32_0 : i32, i32
  }
  func.func @transform_5(%arg0: i32) -> (i32, i32) {
    %c0_i32 = arith.constant 0 : i32
    %c0_i32_0 = arith.constant 0 : i32
    %c0_i32_1 = arith.constant 0 : i32
    return %c0_i32, %c0_i32_0 : i32, i32
  }
  func.func @transform_6(%arg0: i32) -> (i32, i32) {
    %c0_i32 = arith.constant 0 : i32
    %c0_i32_0 = arith.constant 0 : i32
    %c0_i32_1 = arith.constant 0 : i32
    return %c0_i32, %c0_i32_0 : i32, i32
  }
  func.func @transform_7(%arg0: i32) -> (i32, i32) {
    %c0_i32 = arith.constant 0 : i32
    %c0_i32_0 = arith.constant 0 : i32
    %c0_i32_1 = arith.constant 0 : i32
    return %c0_i32, %c0_i32_0 : i32, i32
  }
  func.func @transform_8(%arg0: i32) -> (i32, i32) {
    %c0_i32 = arith.constant 0 : i32
    %c0_i32_0 = arith.constant 0 : i32
    %c0_i32_1 = arith.constant 0 : i32
    return %c0_i32, %c0_i32_0 : i32, i32
  }
  func.func @transform_9(%arg0: i32) -> (i32, i32) {
    %c0_i32 = arith.constant 0 : i32
    %c0_i32_0 = arith.constant 0 : i32
    %c0_i32_1 = arith.constant 0 : i32
    return %c0_i32, %c0_i32_0 : i32, i32
  }
  func.func @transform_10(%arg0: i32) -> (i32, i32) {
    %c0_i32 = arith.constant 0 : i32
    %c0_i32_0 = arith.constant 0 : i32
    %c0_i32_1 = arith.constant 0 : i32
    return %c0_i32, %c0_i32_0 : i32, i32
  }
  func.func @transform_11(%arg0: i32) -> (i32, i32) {
    %c0_i32 = arith.constant 0 : i32
    %c0_i32_0 = arith.constant 0 : i32
    return %c0_i32, %arg0 : i32, i32
  }
}

</mosaic_0001>

<bundles_post_ra>
// kernel: _fcnn_forward_impl.1
= control target key start
LH: loop header
LB: loop body
LE: loop exit
PB: predicated region body
PF: predicated region fallthrough
CT: control target
= control target key end

     0   :  { %16 = vsyncpa [#allocation3], 0  ;;  %s3659_s0 = inlined_call_operand.vmem [shape: bf16[2048,4], index: 0, kind: input, shape index: {}]   ;;  %s3660_s1 = inlined_call_operand.vmem [shape: bf16[32,4], index: 1, kind: input, shape index: {}]   ;;  %s3661_s2 = inlined_call_operand.vmem [shape: f32[32,1], index: 2, kind: input, shape index: {}]   ;;  %s3662_s3 = inlined_call_operand.vmem [shape: bf16[32,32], index: 3, kind: input, shape index: {}]   ;;  %s3663_s4 = inlined_call_operand.vmem [shape: f32[32,1], index: 4, kind: input, shape index: {}]   ;;  %s3664_s5 = inlined_call_operand.vmem [shape: bf16[32,32], index: 5, kind: input, shape index: {}]   ;;  %s3665_s6 = inlined_call_operand.vmem [shape: f32[32,1], index: 6, kind: input, shape index: {}]   ;;  %s3666_s7 = inlined_call_operand.vmem [shape: bf16[32,32], index: 7, kind: input, shape index: {}]   ;;  %s3667_s8 = inlined_call_operand.vmem [shape: f32[32,1], index: 8, kind: input, shape index: {}]   ;;  %s3668_s9 = inlined_call_operand.vmem [shape: bf16[4,32], index: 9, kind: input, shape index: {}]   ;;  %s3669_s10 = inlined_call_operand.vmem [shape: f32[4,1], index: 10, kind: input, shape index: {}]   ;;  %s3670_s11 = inlined_call_operand.hbm [shape: f32[4,2048], index: 11, kind: output, shape index: {}]  }
   0x1   :  { %18 = vsyncpa [#allocation3 + $0x1], 0  ;;  %s3052_s17 = smov 0   ;;  %s3054_s18 = smov 0  }
   0x2   :  { %s3056_s19 = smov 0   ;;  %s3058_s20 = smov 0  }
   0x3 LB: > { %s3073_s21 = sadd.s32 4294967295, %s2988_s20   ;;  %s2451_s22 = sadd.s32 4294967294, %s2988_s20   ;;  %s2988_s20 = sphi %s3058_s20, %s3676_s20   ;;  %s2984_s19 = sphi %s3056_s19, %s3675_s19   ;;  %s2980_s18 = sphi %s3054_s18, %s3674_s18   ;;  %s2976_s17 = sphi %s3052_s17, %s3673_s17  }
   0x4   : > { %s3077_s23 = sadd.s32 1, %s2988_s20   ;;  %s267_s24 = sadd.s32 1, %s2984_s19 }
   0x5   : > { %s264_s25 = ssub.s32 %s2988_s20, %s3077_s23  ;;  %p277_p0 = scmp.ne.s32.totalorder %s2984_s19, %s2980_s18 }
   0x6   : > { %p265_p1 = scmp.eq.s32.totalorder %s264_s25, 0  ;;  %p278_p2 = scmp.eq.s32.totalorder %s3073_s21, 1 }
   0x7   : > { %p283_p3 = scmp.ne.s32.totalorder %s2980_s18, %s2976_s17  ;;  %p284_p4 = scmp.eq.s32.totalorder %s2451_s22, 1 }
   0x8   : > { %s3088_s26 = scalar_select %p265_p1, %s2984_s19, %s267_s24  }
   0x9   : > { %p3090_p5 = por %p278_p2, %p277_p0  ;;  %p3094_p6 = por %p284_p4, %p283_p3 }
   0xa   : > { %p2454_p7 = scmp.ge.s32.totalorder %s2988_s20, 1  ;;  %p341_p8 = scmp.lt.s32.totalorder %s2988_s20, 3 }
   0xc   : > { %p342_p9 = pnand %p2454_p7, %p341_p8 }
   0xd   : > { %s2456_s29 = sshll.u32 (!%p342_p9), %s3073_s21, 7  ;;  %v3104_v0 = vld [vmem:[%s3660_s1] sm:$0xff] (!%p342_p9)   ;;  %vm875_vm0 = vcmask (!%p342_p9), 31744   ;;  %v2990_v17 = vmov (!%p342_p9), 0   ;;  %v523_v55 = vld [vmem:[%s3661_s2 + $0x10] sm:$0xff] (!%p342_p9)  ;;  %v3197_v57 = vld [vmem:[%s3660_s1 + $0x8] sm:$0xff] (!%p342_p9)  }
   0xe   : > { %345 = sbr.rel (%p342_p9) target bundleno = 1359 (0x54f), region = 64  ;;  %p382_p10 = scmp.lt.s32.totalorder (!%p342_p9), %s2456_s29, 255  ;;  %2588 = vmatprep.mubr.msk.bf16.mxu0 (!%p342_p9), %vm875_vm0, %v3104_v0  ;;  %2608 = vmatprep.mubr.msk.bf16.mxu1 (!%p342_p9), %vm875_vm0, %v3104_v0  ;;  %v521_v54 = vld [vmem:[%s3661_s2] sm:$0xff] (!%p342_p9)  ;;  %v522_v61 = vld [vmem:[%s3661_s2 + $0x8] sm:$0xff] (!%p342_p9)  ;;  %v524_v63 = vld [vmem:[%s3661_s2 + $0x18] sm:$0xff] (!%p342_p9)  ;;  %vm1356_vm1 = vcmask (!%p342_p9), 261120  }
   0xf   : > { %2724 = vset.pattern.permute.xlu0 (!%p342_p9), %v2990_v17  ;;  %2725 = vset.pattern.permute.xlu1 (!%p342_p9), %v2990_v17  ;;  %s2991_s25 = smov (!%p342_p9), [#allocation2]  }
  0x10   : > { %527 = vperm.xlu0 (!%p342_p9), %2724, %v521_v54   ;;  %537 = vperm.xlu1 (!%p342_p9), %2725, %v523_v55  }
  0x14   : > { %532 = vperm.xlu0 (!%p342_p9), %2724, %v522_v61   ;;  %542 = vperm.xlu1 (!%p342_p9), %2725, %v524_v63  }
  0x15   : > { %s3678_s29 = smov (!%p382_p10, %s2456_s29), 255 }
  0x16   : > { %s2457_s13 = sshll.u32 %s3678_s29, 2  ;;  %s378_s29 = sand.u32 1, %s2980_s18  }
  0x17   : > { %s3113_s16 = scalar_lea.vmem %s3659_s0, %s2457_s13  ;;  %s2455_s30 = sshll.u32 %s378_s29, 5 }
  0x18   : > { %v2726_v1 = vld [vmem:[%s3113_s16 + $0x40] sm:$0xff]   ;;  %v2730_v6 = vld [vmem:[%s3113_s16 + $0x48] sm:$0xff]   ;;  %v2734_v12 = vld [vmem:[%s3113_s16 + $0x50] sm:$0xff]   ;;  %s380_s12 = scalar_lea.vmem [#allocation2], %s2455_s30  ;;  %s2571_s13 = sshll.u32 %s3073_s21, 9 }
  0x19   : > { %v2727_v2 = vld [vmem:[%s3113_s16 + $0xc0] sm:$0xff]   ;;  %2652 = vmatprep.subr.msk.bf16.mxu0 %vm875_vm0, %v2726_v1  ;;  %v2731_v8 = vld [vmem:[%s3113_s16 + $0xc8] sm:$0xff]   ;;  %v2735_v14 = vld [vmem:[%s3113_s16 + $0xd0] sm:$0xff]   ;;  %s2392_s14 = sshll.u32 %s380_s12, 4  ;;  %s3615_s22 = scalar_lea.hbm %s3670_s11, %s2571_s13  ;;  %s3617_s14 = int_to_ptr.vmem [resolvable:$true] %s2392_s14 }
  0x1a   : > { %v2728_v3 = vld [vmem:[%s3113_s16] sm:$0xff]   ;;  %2660 = vmatprep.subr.msk.bf16.mxu1 %vm875_vm0, %v2727_v2  ;;  %v2732_v9 = vld [vmem:[%s3113_s16 + $0x8] sm:$0xff]   ;;  %v2736_v15 = vld [vmem:[%s3113_s16 + $0x10] sm:$0xff]   ;;  %s2378_s21 = scalar_lea.sflag [#allocation3], %s378_s29  ;;  %s2926_s24 = scalar_lea.vmem %s3617_s14, 512 }
  0x1b   : > { %v2729_v4 = vld [vmem:[%s3113_s16 + $0x80] sm:$0xff]   ;;  %v883_v5 = vsel %vm875_vm0, %v2728_v3, 0  ;;  %v2733_v10 = vld [vmem:[%s3113_s16 + $0x88] sm:$0xff]   ;;  %v886_v11 = vsel %vm875_vm0, %v2732_v9, 0  ;;  %v2737_v16 = vld [vmem:[%s3113_s16 + $0x90] sm:$0xff]   ;;  %v889_v18 = vsel %vm875_vm0, %v2736_v15, 0  ;;  %p2927_p11 = scmp.ne.s32.totalorder %s3617_s14, %s2926_s24 }
  0x1c   : > { %2573 = vmatpush3.bf16.xpose.msra.mxu0 %v883_v5  ;;  %v931_v7 = vsel %vm875_vm0, %v2729_v4, 0  ;;  %v934_v13 = vsel %vm875_vm0, %v2733_v10, 0  ;;  %v2738_v19 = vld [vmem:[%s3113_s16 + $0x58] sm:$0xff]   ;;  %v937_v20 = vsel %vm875_vm0, %v2737_v16, 0  ;;  %v2742_v25 = vld [vmem:[%s3113_s16 + $0x60] sm:$0xff]   ;;  %v2746_v31 = vld [vmem:[%s3113_s16 + $0x68] sm:$0xff]  }
  0x1d   : > { %2593 = vmatpush3.bf16.xpose.msra.mxu1 %v931_v7  ;;  %2653 = vmatprep.subr.msk.bf16.mxu0 %vm875_vm0, %v2730_v6  ;;  %v2739_v21 = vld [vmem:[%s3113_s16 + $0xd8] sm:$0xff]   ;;  %v2743_v27 = vld [vmem:[%s3113_s16 + $0xe0] sm:$0xff]   ;;  %v2747_v33 = vld [vmem:[%s3113_s16 + $0xe8] sm:$0xff]   ;;  %p2928_p12 = pnand %p2927_p11, %p3090_p5  ;;  %s2930_s30 = sshll.u32 %s2991_s25, 4  ;;  %s2931_s30 = int_to_ptr.vmem [resolvable:$false] %s2930_s30 }
  0x1e   : > { %2661 = vmatprep.subr.msk.bf16.mxu1 %vm875_vm0, %v2731_v8  ;;  %v2740_v22 = vld [vmem:[%s3113_s16 + $0x18] sm:$0xff]   ;;  %v2744_v28 = vld [vmem:[%s3113_s16 + $0x20] sm:$0xff]   ;;  %v2748_v34 = vld [vmem:[%s3113_s16 + $0x28] sm:$0xff]   ;;  %s2932_s15 = scalar_lea.vmem %s2931_s30, 1024  ;;  %p2933_p0 = scmp.lt.s32.totalorder %s3617_s14, %s2931_s30 }
  0x1f   : > { %v2741_v23 = vld [vmem:[%s3113_s16 + $0x98] sm:$0xff]   ;;  %v892_v24 = vsel %vm875_vm0, %v2740_v22, 0  ;;  %v2745_v29 = vld [vmem:[%s3113_s16 + $0xa0] sm:$0xff]   ;;  %v895_v30 = vsel %vm875_vm0, %v2744_v28, 0  ;;  %v2749_v35 = vld [vmem:[%s3113_s16 + $0xa8] sm:$0xff]   ;;  %v898_v36 = vsel %vm875_vm0, %v2748_v34, 0  ;;  %p2929_p13 = pneg %p2928_p12  ;;  %p2934_p1 = scmp.lt.s32.totalorder %s2932_s15, %s2926_s24 }
  0x20   : > { %v940_v26 = vsel %vm875_vm0, %v2741_v23, 0  ;;  %v943_v32 = vsel %vm875_vm0, %v2745_v29, 0  ;;  %v2750_v37 = vld [vmem:[%s3113_s16 + $0x70] sm:$0xff]   ;;  %v946_v38 = vsel %vm875_vm0, %v2749_v35, 0  ;;  %v2754_v43 = vld [vmem:[%s3113_s16 + $0x78] sm:$0xff]   ;;  %v2759_v49 = vld [vmem:[%s3113_s16 + $0x140] sm:$0xff]  }
  0x21   : > { %v2751_v39 = vld [vmem:[%s3113_s16 + $0xf0] sm:$0xff]   ;;  %v2755_v45 = vld [vmem:[%s3113_s16 + $0xf8] sm:$0xff]   ;;  %v2760_v51 = vld [vmem:[%s3113_s16 + $0x1c0] sm:$0xff]   ;;  %p2935_p2 = por %p2934_p1, %p2933_p0 }
  0x22   : > { %v2752_v40 = vld [vmem:[%s3113_s16 + $0x30] sm:$0xff]   ;;  %v2756_v46 = vld [vmem:[%s3113_s16 + $0x38] sm:$0xff]   ;;  %v2761_v52 = vld [vmem:[%s3113_s16 + $0x100] sm:$0xff]  }
  0x23   : > { %v2753_v41 = vld [vmem:[%s3113_s16 + $0xb0] sm:$0xff]   ;;  %v901_v42 = vsel %vm875_vm0, %v2752_v40, 0  ;;  %v2757_v47 = vld [vmem:[%s3113_s16 + $0xb8] sm:$0xff]   ;;  %v904_v48 = vsel %vm875_vm0, %v2756_v46, 0  ;;  %v2762_v53 = vld [vmem:[%s3113_s16 + $0x180] sm:$0xff]   ;;  %v979_v56 = vsel %vm875_vm0, %v2761_v52, 0  ;;  %p2936_p3 = pnand %p2935_p2, %p2929_p13 }
  0x24   : > { %2575 = vmatpush3.bf16.xpose.msra.mxu0 %v886_v11  ;;  %v949_v44 = vsel %vm875_vm0, %v2753_v41, 0  ;;  %v952_v50 = vsel %vm875_vm0, %v2757_v47, 0  ;;  %v1027_v58 = vsel %vm875_vm0, %v2762_v53, 0  ;;  %v2764_v59 = vld [vmem:[%s3113_s16 + $0x148] sm:$0xff]   ;;  %v1322_v2 = vld [vmem:[%s3663_s4] sm:$0xff]  ;;  %v2768_v4 = vld [vmem:[%s3113_s16 + $0x150] sm:$0xff]  }
  0x25   : > { %2595 = vmatpush3.bf16.xpose.msra.mxu1 %v934_v13  ;;  %2654 = vmatprep.subr.msk.bf16.mxu0 %vm875_vm0, %v2734_v12  ;;  %v2765_v60 = vld [vmem:[%s3113_s16 + $0x1c8] sm:$0xff]   ;;  %v2769_v6 = vld [vmem:[%s3113_s16 + $0x1d0] sm:$0xff]   ;;  %v1611_v11 = vld [vmem:[%s3665_s6] sm:$0xff] }
  0x26   : > { %2662 = vmatprep.subr.msk.bf16.mxu1 %vm875_vm0, %v2735_v14  ;;  %v2766_v62 = vld [vmem:[%s3113_s16 + $0x108] sm:$0xff]   ;;  %1328 = vperm.xlu0 %2724, %v1322_v2   ;;  %v1324_v7 = vld [vmem:[%s3663_s4 + $0x10] sm:$0xff]  ;;  %v2772_v13 = vld [vmem:[%s3113_s16 + $0x158] sm:$0xff]  }
  0x27   : > { %v2767_v1 = vld [vmem:[%s3113_s16 + $0x188] sm:$0xff]   ;;  %v982_v3 = vsel %vm875_vm0, %v2766_v62, 0  ;;  %v2770_v8 = vld [vmem:[%s3113_s16 + $0x110] sm:$0xff]   ;;  %v1325_v14 = vld [vmem:[%s3663_s4 + $0x18] sm:$0xff] }
  0x28   : > { %v1030_v5 = vsel %vm875_vm0, %v2767_v1, 0  ;;  %v1323_v9 = vld [vmem:[%s3663_s4 + $0x8] sm:$0xff]  ;;  %v2771_v10 = vld [vmem:[%s3113_s16 + $0x190] sm:$0xff]   ;;  %v985_v12 = vsel %vm875_vm0, %v2770_v8, 0  ;;  %v2773_v16 = vld [vmem:[%s3113_s16 + $0x1d8] sm:$0xff]  }
  0x29   : > { %1333 = vperm.xlu1 %2725, %v1323_v9   ;;  %v1033_v15 = vsel %vm875_vm0, %v2771_v10, 0  ;;  %v1899_v22 = vld [vmem:[%s3667_s8] sm:$0xff]  ;;  %v1901_v28 = vld [vmem:[%s3667_s8 + $0x10] sm:$0xff]  ;;  %v2780_v34 = vld [vmem:[%s3113_s16 + $0x168] sm:$0xff]  }
  0x2a   : > { %1338 = vperm.xlu0 %2724, %v1324_v7   ;;  %v2778_v29 = vld [vmem:[%s3113_s16 + $0x120] sm:$0xff]   ;;  %v1902_v35 = vld [vmem:[%s3667_s8 + $0x18] sm:$0xff]  ;;  %v2784_v41 = vld [vmem:[%s3113_s16 + $0x170] sm:$0xff]  }
  0x2b   : > { %v2788_v47 = vld [vmem:[%s3113_s16 + $0x178] sm:$0xff]  }
  0x2c   : > { %2577 = vmatpush3.bf16.xpose.msra.mxu0 %v889_v18  ;;  %v1613_v18 = vld [vmem:[%s3665_s6 + $0x10] sm:$0xff] }
  0x2d   : > { %2597 = vmatpush3.bf16.xpose.msra.mxu1 %v937_v20  ;;  %2655 = vmatprep.subr.msk.bf16.mxu0 %vm875_vm0, %v2738_v19  ;;  %v2774_v19 = vld [vmem:[%s3113_s16 + $0x118] sm:$0xff]   ;;  %v1612_v20 = vld [vmem:[%s3665_s6 + $0x8] sm:$0xff] }
  0x2e   : > { %2663 = vmatprep.subr.msk.bf16.mxu1 %vm875_vm0, %v2739_v21  ;;  %1617 = vperm.xlu0 %2724, %v1611_v11   ;;  %v2775_v21 = vld [vmem:[%s3113_s16 + $0x198] sm:$0xff]   ;;  %v988_v23 = vsel %vm875_vm0, %v2774_v19, 0 }
  0x2f   : > { %1343 = vperm.xlu1 %2725, %v1325_v14  }
  0x32   : > { %1627 = vperm.xlu0 %2724, %v1613_v18  }
  0x33   : > { %1622 = vperm.xlu1 %2725, %v1612_v20  }
  0x34   : > { %2579 = vmatpush3.bf16.xpose.msra.mxu0 %v892_v24  ;;  %v2776_v24 = vld [vmem:[%s3113_s16 + $0x160] sm:$0xff]  }
  0x35   : > { %2599 = vmatpush3.bf16.xpose.msra.mxu1 %v940_v26  ;;  %2656 = vmatprep.subr.msk.bf16.mxu0 %vm875_vm0, %v2742_v25  ;;  %v1614_v25 = vld [vmem:[%s3665_s6 + $0x18] sm:$0xff]  ;;  %v1036_v26 = vsel %vm875_vm0, %v2775_v21, 0 }
  0x36   : > { %2664 = vmatprep.subr.msk.bf16.mxu1 %vm875_vm0, %v2743_v27  ;;  %v2777_v27 = vld [vmem:[%s3113_s16 + $0x1e0] sm:$0xff]   ;;  %1905 = vperm.xlu0 %2724, %v1899_v22  }
  0x37   : > { %1632 = vperm.xlu1 %2725, %v1614_v25  }
  0x3a   : > { %1915 = vperm.xlu0 %2724, %v1901_v28  }
  0x3c   : > { %2581 = vmatpush3.bf16.xpose.msra.mxu0 %v895_v30  ;;  %v1900_v30 = vld [vmem:[%s3667_s8 + $0x8] sm:$0xff] }
  0x3d   : > { %2601 = vmatpush3.bf16.xpose.msra.mxu1 %v943_v32  ;;  %2657 = vmatprep.subr.msk.bf16.mxu0 %vm875_vm0, %v2746_v31  ;;  %v2779_v31 = vld [vmem:[%s3113_s16 + $0x1a0] sm:$0xff]  }
  0x3e   : > { %2665 = vmatprep.subr.msk.bf16.mxu1 %vm875_vm0, %v2747_v33  ;;  %v2184_v32 = vld [vmem:[%s3669_s10] sm:$0xf]  ;;  %1910 = vperm.xlu1 %2725, %v1900_v30   ;;  %v991_v33 = vsel %vm875_vm0, %v2778_v29, 0 }
  0x3f   : > { %2187 = vperm.xlu0 %2724, %v2184_v32  }
  0x42   : > { %1920 = vperm.xlu1 %2725, %v1902_v35  }
  0x44   : > { %2583 = vmatpush3.bf16.xpose.msra.mxu0 %v898_v36  ;;  %v1039_v36 = vsel %vm875_vm0, %v2779_v31, 0 }
  0x45   : > { %2603 = vmatpush3.bf16.xpose.msra.mxu1 %v946_v38  ;;  %2658 = vmatprep.subr.msk.bf16.mxu0 %vm875_vm0, %v2750_v37  ;;  %v2781_v37 = vld [vmem:[%s3113_s16 + $0x1e8] sm:$0xff]  }
  0x46   : > { %2666 = vmatprep.subr.msk.bf16.mxu1 %vm875_vm0, %v2751_v39  ;;  %v2782_v38 = vld [vmem:[%s3113_s16 + $0x128] sm:$0xff]  }
  0x47   : > { %v2783_v39 = vld [vmem:[%s3113_s16 + $0x1a8] sm:$0xff]   ;;  %v994_v40 = vsel %vm875_vm0, %v2782_v38, 0 }
  0x4c   : > { %2585 = vmatpush3.bf16.xpose.msra.mxu0 %v901_v42  ;;  %v1042_v42 = vsel %vm875_vm0, %v2783_v39, 0 }
  0x4d   : > { %2605 = vmatpush3.bf16.xpose.msra.mxu1 %v949_v44  ;;  %2659 = vmatprep.subr.msk.bf16.mxu0 %vm875_vm0, %v2754_v43  ;;  %v2785_v43 = vld [vmem:[%s3113_s16 + $0x1f0] sm:$0xff]  }
  0x4e   : > { %2667 = vmatprep.subr.msk.bf16.mxu1 %vm875_vm0, %v2755_v45  ;;  %v2786_v44 = vld [vmem:[%s3113_s16 + $0x130] sm:$0xff]  }
  0x4f   : > { %v2787_v45 = vld [vmem:[%s3113_s16 + $0x1b0] sm:$0xff]   ;;  %v997_v46 = vsel %vm875_vm0, %v2786_v44, 0  ;;  %v3369_v44 = vld [vmem:[%s3662_s3 + $0x8] sm:$0xff]  }
  0x54   : > { %2587 = vmatpush3.bf16.xpose.msra.mxu0 %v904_v48  ;;  %v1045_v48 = vsel %vm875_vm0, %v2787_v45, 0 }
  0x55   : > { %2607 = vmatpush3.bf16.xpose.msra.mxu1 %v952_v50  ;;  %2668 = vmatprep.subr.msk.bf16.mxu0 %vm875_vm0, %v2759_v49  ;;  %v2789_v49 = vld [vmem:[%s3113_s16 + $0x1f8] sm:$0xff]  }
  0x56   : > { %2676 = vmatprep.subr.msk.bf16.mxu1 %vm875_vm0, %v2760_v51  ;;  %v2790_v50 = vld [vmem:[%s3113_s16 + $0x138] sm:$0xff]  }
  0x57   : > { %v2791_v51 = vld [vmem:[%s3113_s16 + $0x1b8] sm:$0xff]   ;;  %v1000_v52 = vsel %vm875_vm0, %v2790_v50, 0 }
  0x58   : > { %v1048_v53 = vsel %vm875_vm0, %v2791_v51, 0 }
  0x5b   : > { %2589 = vmatmul.mubr.msk.bf16.vlgmr.msra.gmra.mrb[0].mxu0 %vm875_vm0, %v3104_v0 }
  0x5c   : > { %2609 = vmatmul.mubr.msk.bf16.vlgmr.msra.gmra.mrb[0].mxu1 %vm875_vm0, %v3104_v0  ;;  %2613 = vmatpush3.bf16.xpose.msra.mxu0 %v979_v56 }
  0x5d   : > { %2633 = vmatpush3.bf16.xpose.msra.mxu1 %v1027_v58  ;;  %2590 = vmatprep.mubr.msk.bf16.mxu0 %vm875_vm0, %v3197_v57 }
  0x5e   : > { %2610 = vmatprep.mubr.msk.bf16.mxu1 %vm875_vm0, %v3197_v57  ;;  %2669 = vmatprep.subr.msk.bf16.mxu0 %vm875_vm0, %v2764_v59 }
  0x5f   : > { %2677 = vmatprep.subr.msk.bf16.mxu1 %vm875_vm0, %v2765_v60 }
  0x63   : > { %2591 = vmatmul.mubr.msk.bf16.gmra.mrb[4].mxu0 %vm875_vm0, %v3197_v57 }
  0x64   : > { %2611 = vmatmul.mubr.msk.bf16.gmra.mrb[4].mxu1 %vm875_vm0, %v3197_v57  ;;  %2615 = vmatpush3.bf16.xpose.msra.mxu0 %v982_v3 }
  0x65   : > { %2635 = vmatpush3.bf16.xpose.msra.mxu1 %v1030_v5  ;;  %2670 = vmatprep.subr.msk.bf16.mxu0 %vm875_vm0, %v2768_v4 }
  0x66   : > { %2678 = vmatprep.subr.msk.bf16.mxu1 %vm875_vm0, %v2769_v6  ;;  %2628 = vmatprep.mubr.msk.bf16.mxu0 %vm875_vm0, %v3104_v0 }
  0x67   : > { %2648 = vmatprep.mubr.msk.bf16.mxu1 %vm875_vm0, %v3104_v0 }
  0x6c   : > { %2617 = vmatpush3.bf16.xpose.msra.mxu0 %v985_v12 }
  0x6d   : > { %2637 = vmatpush3.bf16.xpose.msra.mxu1 %v1033_v15  ;;  %2671 = vmatprep.subr.msk.bf16.mxu0 %vm875_vm0, %v2772_v13 }
  0x6e   : > { %2679 = vmatprep.subr.msk.bf16.mxu1 %vm875_vm0, %v2773_v16 }
  0x74   : > { %2619 = vmatpush3.bf16.xpose.msra.mxu0 %v988_v23 }
  0x75   : > { %2639 = vmatpush3.bf16.xpose.msra.mxu1 %v1036_v26  ;;  %2672 = vmatprep.subr.msk.bf16.mxu0 %vm875_vm0, %v2776_v24 }
  0x76   : > { %2680 = vmatprep.subr.msk.bf16.mxu1 %vm875_vm0, %v2777_v27 }
  0x7c   : > { %2621 = vmatpush3.bf16.xpose.msra.mxu0 %v991_v33 }
  0x7d   : > { %2641 = vmatpush3.bf16.xpose.msra.mxu1 %v1039_v36  ;;  %2673 = vmatprep.subr.msk.bf16.mxu0 %vm875_vm0, %v2780_v34 }
  0x7e   : > { %2681 = vmatprep.subr.msk.bf16.mxu1 %vm875_vm0, %v2781_v37 }
  0x84   : > { %2623 = vmatpush3.bf16.xpose.msra.mxu0 %v994_v40 }
  0x85   : > { %2643 = vmatpush3.bf16.xpose.msra.mxu1 %v1042_v42  ;;  %2674 = vmatprep.subr.msk.bf16.mxu0 %vm875_vm0, %v2784_v41 }
  0x86   : > { %2682 = vmatprep.subr.msk.bf16.mxu1 %vm875_vm0, %v2785_v43  ;;  %v3358_v43 = vld [vmem:[%s3662_s3] sm:$0xff]  }
  0x8c   : > { %2625 = vmatpush3.bf16.xpose.msra.mxu0 %v997_v46 }
  0x8d   : > { %2645 = vmatpush3.bf16.xpose.msra.mxu1 %v1045_v48  ;;  %2675 = vmatprep.subr.msk.bf16.mxu0 %vm875_vm0, %v2788_v47 }
  0x8e   : > { %2683 = vmatprep.subr.msk.bf16.mxu1 %vm875_vm0, %v2789_v49 }
  0x8f   : > { %v3331_v54 = vpop.permute.xlu0 %527  ;;  %v3333_v55 = vpop.permute.xlu1 %537 }
  0x93   : > { %v3335_v56 = vpop.permute.xlu0 %532  ;;  %v3345_v14 = vpop.permute.xlu1 %542 }
  0x94   : > { %2627 = vmatpush3.bf16.xpose.msra.mxu0 %v1000_v52 }
  0x95   : > { %2647 = vmatpush3.bf16.xpose.msra.mxu1 %v1048_v53 }
  0x9b   : > { %2629 = vmatmul.mubr.msk.bf16.vlgmr.msra.gmra.mrb[8].mxu0 %vm875_vm0, %v3104_v0 }
  0x9c   : > { %2649 = vmatmul.mubr.msk.bf16.vlgmr.msra.gmra.mrb[8].mxu1 %vm875_vm0, %v3104_v0  ;;  %2630 = vmatprep.mubr.msk.bf16.mxu0 %vm875_vm0, %v3197_v57 }
  0x9d   : > { %2650 = vmatprep.mubr.msk.bf16.mxu1 %vm875_vm0, %v3197_v57 }
  0xa3   : > { %2631 = vmatmul.mubr.msk.bf16.gmra.mrb[12].mxu0 %vm875_vm0, %v3197_v57 }
  0xa4   : > { %2651 = vmatmul.mubr.msk.bf16.gmra.mrb[12].mxu1 %vm875_vm0, %v3197_v57  ;;  %1395 = vmatprep.mubr.bf16.mxu0 %v2990_v17 }
  0xa5   : > { %1448 = vmatprep.mubr.bf16.mxu1 %v2990_v17 }
 0x12e   : > { %v1108_v0 = vpop.f32.mrb[0].mxu0 }
 0x12f   : > { %v1109_v58 = vadd.f32 %v1108_v0, %v3331_v54  ;;  %v1161_v59 = vpop.f32.mrb[0].mxu1  ;;  %v1110_v60 = vpop.f32.mrb[1].mxu0 }
 0x130   : > { %v1162_v61 = vadd.f32 %v1161_v59, %v3331_v54  ;;  %v1163_v62 = vpop.f32.mrb[1].mxu1  ;;  %v1112_v63 = vpop.f32.mrb[2].mxu0  ;;  %v1111_v3 = vadd.f32 %v1110_v60, %v3331_v54 }
 0x131   : > { %v1113_v57 = vadd.f32 %v1112_v63, %v3335_v56  ;;  %v1165_v1 = vpop.f32.mrb[2].mxu1  ;;  %v1114_v2 = vpop.f32.mrb[3].mxu0  ;;  %v1164_v7 = vadd.f32 %v1163_v62, %v3331_v54 }
 0x132   : > { %v1166_v4 = vadd.f32 %v1165_v1, %v3335_v56  ;;  %v1115_v5 = vadd.f32 %v1114_v2, %v3335_v56  ;;  %v1167_v6 = vpop.f32.mrb[3].mxu1 }
 0x133   : > { %v1286_v8 = vpack.c.bf16 %v1113_v57, %v1109_v58  ;;  %v1168_v9 = vadd.f32 %v1167_v6, %v3335_v56 }
 0x134   : > { %v1288_v10 = vpack.c.bf16 %v1166_v4, %v1162_v61  ;;  %v1287_v11 = vpack.c.bf16 %v1115_v5, %v1111_v3 }
 0x135   : > { %v1289_v12 = vpack.c.bf16 %v1168_v9, %v1164_v7  ;;  %2798 = vtanh.bf16 %v1286_v8 }
 0x136   : > { %v1118_v13 = vpop.f32.mrb[4].mxu0  ;;  %2800 = vtanh.bf16 %v1287_v11 }
 0x137   : > { %v1119_v15 = vadd.f32 %v1118_v13, %v3333_v55  ;;  %v1171_v16 = vpop.f32.mrb[4].mxu1  ;;  %v1120_v18 = vpop.f32.mrb[5].mxu0  ;;  %2802 = vtanh.bf16 %v1289_v12 }
 0x138   : > { %v1172_v19 = vadd.f32 %v1171_v16, %v3333_v55  ;;  %v1121_v20 = vadd.f32 %v1120_v18, %v3333_v55  ;;  %v1173_v21 = vpop.f32.mrb[5].mxu1  ;;  %v1122_v22 = vpop.f32.mrb[6].mxu0  ;;  %2804 = vtanh.bf16 %v1288_v10 }
 0x139   : > { %v1174_v23 = vadd.f32 %v1173_v21, %v3333_v55  ;;  %v1175_v24 = vpop.f32.mrb[6].mxu1  ;;  %v1123_v25 = vadd.f32 %v1122_v22, %v3345_v14  ;;  %v1124_v26 = vpop.f32.mrb[7].mxu0 }
 0x13a   : > { %v1176_v27 = vadd.f32 %v1175_v24, %v3345_v14  ;;  %v1125_v28 = vadd.f32 %v1124_v26, %v3345_v14  ;;  %v1177_v29 = vpop.f32.mrb[7].mxu1 }
 0x13b   : > { %v1294_v30 = vpack.c.bf16 %v1123_v25, %v1119_v15  ;;  %v1178_v31 = vadd.f32 %v1177_v29, %v3345_v14 }
 0x13c   : > { %v1296_v32 = vpack.c.bf16 %v1176_v27, %v1172_v19  ;;  %v1295_v33 = vpack.c.bf16 %v1125_v28, %v1121_v20 }
 0x13d   : > { %2806 = vtanh.bf16 %v1294_v30  ;;  %v1297_v34 = vpack.c.bf16 %v1178_v31, %v1174_v23  ;;  %v3405_v30 = vpop.permute.xlu0 %1328  ;;  %v3407_v31 = vpop.permute.xlu1 %1333 }
 0x13e   : > { %2808 = vtanh.bf16 %v1296_v32 }
 0x13f   : > { %2810 = vtanh.bf16 %v1295_v33 }
 0x140   : > { %2812 = vtanh.bf16 %v1297_v34  ;;  %v2799_v35 = vpop.eup %2798 }
 0x141   : > { %v2801_v36 = vpop.eup %2800 }
 0x142   : > { %v2803_v37 = vpop.eup %2802  ;;  %1363 = vmatprep.subr.bf16.mxu0 %v2801_v36 }
 0x143   : > { %v2805_v38 = vpop.eup %2804  ;;  %1416 = vmatprep.subr.bf16.mxu1 %v2803_v37  ;;  %1364 = vmatpush1.bf16.msra.mxu0 %v2799_v35 }
 0x144   : > { %1417 = vmatpush1.bf16.msra.mxu1 %v2805_v38 }
 0x148   : > { %v2807_v39 = vpop.eup %2806 }
 0x149   : > { %v2809_v40 = vpop.eup %2808 }
 0x14a   : > { %v2811_v41 = vpop.eup %2810 }
 0x14b   : > { %v2813_v42 = vpop.eup %2812  ;;  %1365 = vmatprep.subr.bf16.mxu0 %v2811_v41 }
 0x14c   : > { %1418 = vmatprep.subr.bf16.mxu1 %v2813_v42  ;;  %1366 = vmatpush1.bf16.msra.mxu0 %v2807_v39 }
 0x14d   : > { %1419 = vmatpush1.bf16.msra.mxu1 %v2809_v40 }
 0x14f   : > { %2534 = vmatmul.mubr.msk.bf16.vlgmr.msra.gmra.mrb[16].mxu0 %vm1356_vm1, %v3358_v43 }
 0x150   : > { %2536 = vmatmul.mubr.msk.bf16.vlgmr.msra.gmra.mrb[16].mxu1 %vm1356_vm1, %v3358_v43  ;;  %1405 = vmatprep.mubr.bf16.mxu0 %v2990_v17 }
 0x151   : > { %1458 = vmatprep.mubr.bf16.mxu1 %v2990_v17 }
 0x157   : > { %2535 = vmatmul.mubr.msk.bf16.gmra.mrb[20].mxu0 %vm1356_vm1, %v3369_v44 }
 0x158   : > { %2537 = vmatmul.mubr.msk.bf16.gmra.mrb[20].mxu1 %vm1356_vm1, %v3369_v44  ;;  %1501 = vmatprep.mubr.bf16.mxu0 %v2990_v17 }
 0x159   : > { %1554 = vmatprep.mubr.bf16.mxu1 %v2990_v17 }
 0x16e   : > { %v1214_v45 = vpop.f32.mrb[8].mxu0 }
 0x16f   : > { %v1267_v46 = vpop.f32.mrb[8].mxu1  ;;  %v1216_v47 = vpop.f32.mrb[9].mxu0  ;;  %v1215_v50 = vadd.f32 %v1214_v45, %v3331_v54 }
 0x170   : > { %v1269_v48 = vpop.f32.mrb[9].mxu1  ;;  %v1218_v49 = vpop.f32.mrb[10].mxu0  ;;  %v1268_v0 = vadd.f32 %v1267_v46, %v3331_v54  ;;  %v1217_v58 = vadd.f32 %v1216_v47, %v3331_v54 }
 0x171   : > { %v1219_v51 = vadd.f32 %v1218_v49, %v3335_v56  ;;  %v1271_v52 = vpop.f32.mrb[10].mxu1  ;;  %v1220_v53 = vpop.f32.mrb[11].mxu0  ;;  %v1270_v62 = vadd.f32 %v1269_v48, %v3331_v54 }
 0x172   : > { %v1272_v59 = vadd.f32 %v1271_v52, %v3335_v56  ;;  %v1221_v60 = vadd.f32 %v1220_v53, %v3335_v56  ;;  %v1273_v61 = vpop.f32.mrb[11].mxu1  ;;  %v3419_v53 = vpop.permute.xlu1 %1343 }
 0x173   : > { %v1290_v63 = vpack.c.bf16 %v1219_v51, %v1215_v50  ;;  %v1274_v57 = vadd.f32 %v1273_v61, %v3335_v56  ;;  %v3417_v51 = vpop.permute.xlu0 %1338 }
 0x174   : > { %v1292_v1 = vpack.c.bf16 %v1272_v59, %v1268_v0  ;;  %v1291_v2 = vpack.c.bf16 %v1221_v60, %v1217_v58 }
 0x175   : > { %v1293_v3 = vpack.c.bf16 %v1274_v57, %v1270_v62  ;;  %2814 = vtanh.bf16 %v1290_v63 }
 0x176   : > { %v1224_v4 = vpop.f32.mrb[12].mxu0  ;;  %2816 = vtanh.bf16 %v1291_v2 }
 0x177   : > { %v1277_v5 = vpop.f32.mrb[12].mxu1  ;;  %v1226_v6 = vpop.f32.mrb[13].mxu0  ;;  %2818 = vtanh.bf16 %v1293_v3  ;;  %v1225_v9 = vadd.f32 %v1224_v4, %v3333_v55 }
 0x178   : > { %v1279_v7 = vpop.f32.mrb[13].mxu1  ;;  %v1228_v8 = vpop.f32.mrb[14].mxu0  ;;  %2820 = vtanh.bf16 %v1292_v1  ;;  %v1278_v56 = vadd.f32 %v1277_v5, %v3333_v55  ;;  %v1227_v12 = vadd.f32 %v1226_v6, %v3333_v55 }
 0x179   : > { %v1229_v10 = vadd.f32 %v1228_v8, %v3345_v14  ;;  %v1281_v54 = vpop.f32.mrb[14].mxu1  ;;  %v1230_v11 = vpop.f32.mrb[15].mxu0  ;;  %v1280_v18 = vadd.f32 %v1279_v7, %v3333_v55 }
 0x17a   : > { %v1282_v13 = vadd.f32 %v1281_v54, %v3345_v14  ;;  %v1231_v15 = vadd.f32 %v1230_v11, %v3345_v14  ;;  %v1283_v16 = vpop.f32.mrb[15].mxu1 }
 0x17b   : > { %v1298_v19 = vpack.c.bf16 %v1229_v10, %v1225_v9  ;;  %v1284_v20 = vadd.f32 %v1283_v16, %v3345_v14 }
 0x17c   : > { %v1300_v21 = vpack.c.bf16 %v1282_v13, %v1278_v56  ;;  %v1299_v22 = vpack.c.bf16 %v1231_v15, %v1227_v12 }
 0x17d   : > { %v1301_v23 = vpack.c.bf16 %v1284_v20, %v1280_v18  ;;  %2822 = vtanh.bf16 %v1298_v19  ;;  %v3432_v20 = vld [vmem:[%s3664_s5] sm:$0xff]  }
 0x17e   : > { %2824 = vtanh.bf16 %v1299_v22  ;;  %v3443_v22 = vld [vmem:[%s3664_s5 + $0x8] sm:$0xff]  }
 0x17f   : > { %2826 = vtanh.bf16 %v1301_v23 }
 0x180   : > { %v2815_v24 = vpop.eup %2814  ;;  %2828 = vtanh.bf16 %v1300_v21 }
 0x181   : > { %v2817_v25 = vpop.eup %2816 }
 0x182   : > { %v2819_v26 = vpop.eup %2818  ;;  %1469 = vmatprep.subr.bf16.mxu0 %v2817_v25 }
 0x183   : > { %v2821_v27 = vpop.eup %2820  ;;  %1522 = vmatprep.subr.bf16.mxu1 %v2819_v26  ;;  %1470 = vmatpush1.bf16.msra.mxu0 %v2815_v24 }
 0x184   : > { %1523 = vmatpush1.bf16.msra.mxu1 %v2821_v27 }
 0x188   : > { %v2823_v28 = vpop.eup %2822 }
 0x189   : > { %v2825_v55 = vpop.eup %2824 }
 0x18a   : > { %v2827_v29 = vpop.eup %2826  ;;  %1471 = vmatprep.subr.bf16.mxu0 %v2825_v55 }
 0x18b   : > { %v2829_v14 = vpop.eup %2828  ;;  %1524 = vmatprep.subr.bf16.mxu1 %v2827_v29  ;;  %1472 = vmatpush1.bf16.msra.mxu0 %v2823_v28 }
 0x18c   : > { %1525 = vmatpush1.bf16.msra.mxu1 %v2829_v14 }
 0x18e   : > { %2538 = vmatmul.mubr.msk.bf16.vlgmr.msra.gmra.mrb[24].mxu0 %vm1356_vm1, %v3358_v43 }
 0x18f   : > { %2540 = vmatmul.mubr.msk.bf16.vlgmr.msra.gmra.mrb[24].mxu1 %vm1356_vm1, %v3358_v43  ;;  %1511 = vmatprep.mubr.bf16.mxu0 %v2990_v17 }
 0x190   : > { %1564 = vmatprep.mubr.bf16.mxu1 %v2990_v17 }
 0x196   : > { %2539 = vmatmul.mubr.msk.bf16.gmra.mrb[28].mxu0 %vm1356_vm1, %v3369_v44 }
 0x197   : > { %2541 = vmatmul.mubr.msk.bf16.gmra.mrb[28].mxu1 %vm1356_vm1, %v3369_v44  ;;  %1683 = vmatprep.mubr.bf16.mxu0 %v2990_v17 }
 0x198   : > { %1736 = vmatprep.mubr.bf16.mxu1 %v2990_v17 }
 0x222   : > { %v1397_v32 = vpop.f32.mrb[16].mxu0 }
 0x223   : > { %v1450_v33 = vpop.f32.mrb[16].mxu1  ;;  %v1399_v34 = vpop.f32.mrb[17].mxu0  ;;  %v1398_v37 = vadd.f32 %v1397_v32, %v3405_v30 }
 0x224   : > { %v1452_v35 = vpop.f32.mrb[17].mxu1  ;;  %v1401_v36 = vpop.f32.mrb[18].mxu0  ;;  %v1451_v41 = vadd.f32 %v1450_v33, %v3405_v30  ;;  %v1400_v42 = vadd.f32 %v1399_v34, %v3405_v30 }
 0x225   : > { %v1402_v38 = vadd.f32 %v1401_v36, %v3407_v31  ;;  %v1454_v39 = vpop.f32.mrb[18].mxu1  ;;  %v1403_v40 = vpop.f32.mrb[19].mxu0  ;;  %v1453_v46 = vadd.f32 %v1452_v35, %v3405_v30 }
 0x226   : > { %v1455_v43 = vadd.f32 %v1454_v39, %v3407_v31  ;;  %v1404_v44 = vadd.f32 %v1403_v40, %v3407_v31  ;;  %v1456_v45 = vpop.f32.mrb[19].mxu1 }
 0x227   : > { %v1575_v47 = vpack.c.bf16 %v1402_v38, %v1398_v37  ;;  %v1457_v48 = vadd.f32 %v1456_v45, %v3407_v31 }
 0x228   : > { %v1577_v49 = vpack.c.bf16 %v1455_v43, %v1451_v41  ;;  %v1576_v50 = vpack.c.bf16 %v1404_v44, %v1400_v42 }
 0x229   : > { %v1578_v52 = vpack.c.bf16 %v1457_v48, %v1453_v46  ;;  %2830 = vtanh.bf16 %v1575_v47 }
 0x22a   : > { %v1407_v0 = vpop.f32.mrb[20].mxu0  ;;  %2832 = vtanh.bf16 %v1576_v50 }
 0x22b   : > { %v1460_v58 = vpop.f32.mrb[20].mxu1  ;;  %v1409_v59 = vpop.f32.mrb[21].mxu0  ;;  %2834 = vtanh.bf16 %v1578_v52  ;;  %v1408_v62 = vadd.f32 %v1407_v0, %v3417_v51 }
 0x22c   : > { %v1462_v60 = vpop.f32.mrb[21].mxu1  ;;  %v1411_v61 = vpop.f32.mrb[22].mxu0  ;;  %2836 = vtanh.bf16 %v1577_v49  ;;  %v1461_v2 = vadd.f32 %v1460_v58, %v3417_v51  ;;  %v1410_v3 = vadd.f32 %v1409_v59, %v3417_v51 }
 0x22d   : > { %v1412_v63 = vadd.f32 %v1411_v61, %v3419_v53  ;;  %v1464_v57 = vpop.f32.mrb[22].mxu1  ;;  %v1413_v1 = vpop.f32.mrb[23].mxu0  ;;  %v1463_v7 = vadd.f32 %v1462_v60, %v3417_v51 }
 0x22e   : > { %v1465_v4 = vadd.f32 %v1464_v57, %v3419_v53  ;;  %v1414_v5 = vadd.f32 %v1413_v1, %v3419_v53  ;;  %v1466_v6 = vpop.f32.mrb[23].mxu1 }
 0x22f   : > { %v1583_v8 = vpack.c.bf16 %v1412_v63, %v1408_v62  ;;  %v1467_v9 = vadd.f32 %v1466_v6, %v3419_v53 }
 0x230   : > { %v1585_v10 = vpack.c.bf16 %v1465_v4, %v1461_v2  ;;  %v1584_v54 = vpack.c.bf16 %v1414_v5, %v1410_v3 }
 0x231   : > { %v1586_v11 = vpack.c.bf16 %v1467_v9, %v1463_v7  ;;  %2838 = vtanh.bf16 %v1583_v8  ;;  %v3479_v8 = vpop.permute.xlu0 %1617  ;;  %v3481_v9 = vpop.permute.xlu1 %1622 }
 0x232   : > { %2840 = vtanh.bf16 %v1584_v54 }
 0x233   : > { %2842 = vtanh.bf16 %v1586_v11 }
 0x234   : > { %v2831_v56 = vpop.eup %2830  ;;  %2844 = vtanh.bf16 %v1585_v10 }
 0x235   : > { %v2833_v12 = vpop.eup %2832 }
 0x236   : > { %v2835_v13 = vpop.eup %2834  ;;  %1651 = vmatprep.subr.bf16.mxu0 %v2833_v12 }
 0x237   : > { %v2837_v15 = vpop.eup %2836  ;;  %1704 = vmatprep.subr.bf16.mxu1 %v2835_v13  ;;  %1652 = vmatpush1.bf16.msra.mxu0 %v2831_v56 }
 0x238   : > { %1705 = vmatpush1.bf16.msra.mxu1 %v2837_v15 }
 0x23c   : > { %v2839_v16 = vpop.eup %2838 }
 0x23d   : > { %v2841_v18 = vpop.eup %2840 }
 0x23e   : > { %v2843_v19 = vpop.eup %2842  ;;  %1653 = vmatprep.subr.bf16.mxu0 %v2841_v18 }
 0x23f   : > { %v2845_v21 = vpop.eup %2844  ;;  %1706 = vmatprep.subr.bf16.mxu1 %v2843_v19  ;;  %1654 = vmatpush1.bf16.msra.mxu0 %v2839_v16 }
 0x240   : > { %1707 = vmatpush1.bf16.msra.mxu1 %v2845_v21 }
 0x242   : > { %2544 = vmatmul.mubr.msk.bf16.vlgmr.msra.gmra.mrb[32].mxu0 %vm1356_vm1, %v3432_v20 }
 0x243   : > { %2546 = vmatmul.mubr.msk.bf16.vlgmr.msra.gmra.mrb[32].mxu1 %vm1356_vm1, %v3432_v20  ;;  %1693 = vmatprep.mubr.bf16.mxu0 %v2990_v17 }
 0x244   : > { %1746 = vmatprep.mubr.bf16.mxu1 %v2990_v17 }
 0x24a   : > { %2545 = vmatmul.mubr.msk.bf16.gmra.mrb[36].mxu0 %vm1356_vm1, %v3443_v22 }
 0x24b   : > { %2547 = vmatmul.mubr.msk.bf16.gmra.mrb[36].mxu1 %vm1356_vm1, %v3443_v22  ;;  %1789 = vmatprep.mubr.bf16.mxu0 %v2990_v17 }
 0x24c   : > { %1842 = vmatprep.mubr.bf16.mxu1 %v2990_v17 }
 0x261   : > { %v1503_v23 = vpop.f32.mrb[24].mxu0 }
 0x262   : > { %v1556_v24 = vpop.f32.mrb[24].mxu1  ;;  %v1505_v25 = vpop.f32.mrb[25].mxu0  ;;  %v1504_v28 = vadd.f32 %v1503_v23, %v3405_v30 }
 0x263   : > { %v1558_v26 = vpop.f32.mrb[25].mxu1  ;;  %v1507_v27 = vpop.f32.mrb[26].mxu0  ;;  %v1557_v32 = vadd.f32 %v1556_v24, %v3405_v30  ;;  %v1506_v33 = vadd.f32 %v1505_v25, %v3405_v30 }
 0x264   : > { %v1508_v55 = vadd.f32 %v1507_v27, %v3407_v31  ;;  %v1560_v29 = vpop.f32.mrb[26].mxu1  ;;  %v1509_v14 = vpop.f32.mrb[27].mxu0  ;;  %v1559_v37 = vadd.f32 %v1558_v26, %v3405_v30 }
 0x265   : > { %v1561_v34 = vadd.f32 %v1560_v29, %v3407_v31  ;;  %v1510_v35 = vadd.f32 %v1509_v14, %v3407_v31  ;;  %v1562_v36 = vpop.f32.mrb[27].mxu1  ;;  %v3493_v14 = vpop.permute.xlu1 %1632 }
 0x266   : > { %v1579_v38 = vpack.c.bf16 %v1508_v55, %v1504_v28  ;;  %v1563_v39 = vadd.f32 %v1562_v36, %v3407_v31  ;;  %v3491_v55 = vpop.permute.xlu0 %1627 }
 0x267   : > { %v1581_v40 = vpack.c.bf16 %v1561_v34, %v1557_v32  ;;  %v1580_v41 = vpack.c.bf16 %v1510_v35, %v1506_v33 }
 0x268   : > { %v1582_v42 = vpack.c.bf16 %v1563_v39, %v1559_v37  ;;  %2846 = vtanh.bf16 %v1579_v38 }
 0x269   : > { %v1513_v43 = vpop.f32.mrb[28].mxu0  ;;  %2848 = vtanh.bf16 %v1580_v41 }
 0x26a   : > { %v1566_v44 = vpop.f32.mrb[28].mxu1  ;;  %v1515_v45 = vpop.f32.mrb[29].mxu0  ;;  %2850 = vtanh.bf16 %v1582_v42  ;;  %v1514_v48 = vadd.f32 %v1513_v43, %v3417_v51 }
 0x26b   : > { %v1568_v46 = vpop.f32.mrb[29].mxu1  ;;  %v1517_v47 = vpop.f32.mrb[30].mxu0  ;;  %2852 = vtanh.bf16 %v1581_v40  ;;  %v1567_v31 = vadd.f32 %v1566_v44, %v3417_v51  ;;  %v1516_v52 = vadd.f32 %v1515_v45, %v3417_v51 }
 0x26c   : > { %v1518_v49 = vadd.f32 %v1517_v47, %v3419_v53  ;;  %v1570_v30 = vpop.f32.mrb[30].mxu1  ;;  %v1519_v50 = vpop.f32.mrb[31].mxu0  ;;  %v1569_v60 = vadd.f32 %v1568_v46, %v3417_v51 }
 0x26d   : > { %v1571_v0 = vadd.f32 %v1570_v30, %v3419_v53  ;;  %v1520_v58 = vadd.f32 %v1519_v50, %v3419_v53  ;;  %v1572_v59 = vpop.f32.mrb[31].mxu1 }
 0x26e   : > { %v1587_v61 = vpack.c.bf16 %v1518_v49, %v1514_v48  ;;  %v1573_v62 = vadd.f32 %v1572_v59, %v3419_v53 }
 0x26f   : > { %v1589_v63 = vpack.c.bf16 %v1571_v0, %v1567_v31  ;;  %v1588_v57 = vpack.c.bf16 %v1520_v58, %v1516_v52 }
 0x270   : > { %v1590_v1 = vpack.c.bf16 %v1573_v62, %v1569_v60  ;;  %2854 = vtanh.bf16 %v1587_v61  ;;  %v3506_v62 = vld [vmem:[%s3666_s7] sm:$0xff]  }
 0x271   : > { %2856 = vtanh.bf16 %v1588_v57  ;;  %v3517_v57 = vld [vmem:[%s3666_s7 + $0x8] sm:$0xff]  }
 0x272   : > { %2858 = vtanh.bf16 %v1590_v1 }
 0x273   : > { %v2847_v2 = vpop.eup %2846  ;;  %2860 = vtanh.bf16 %v1589_v63 }
 0x274   : > { %v2849_v3 = vpop.eup %2848 }
 0x275   : > { %v2851_v4 = vpop.eup %2850  ;;  %1757 = vmatprep.subr.bf16.mxu0 %v2849_v3 }
 0x276   : > { %v2853_v5 = vpop.eup %2852  ;;  %1810 = vmatprep.subr.bf16.mxu1 %v2851_v4  ;;  %1758 = vmatpush1.bf16.msra.mxu0 %v2847_v2 }
 0x277   : > { %1811 = vmatpush1.bf16.msra.mxu1 %v2853_v5 }
 0x27b   : > { %v2855_v6 = vpop.eup %2854 }
 0x27c   : > { %v2857_v51 = vpop.eup %2856 }
 0x27d   : > { %v2859_v7 = vpop.eup %2858  ;;  %1759 = vmatprep.subr.bf16.mxu0 %v2857_v51 }
 0x27e   : > { %v2861_v53 = vpop.eup %2860  ;;  %1812 = vmatprep.subr.bf16.mxu1 %v2859_v7  ;;  %1760 = vmatpush1.bf16.msra.mxu0 %v2855_v6 }
 0x27f   : > { %1813 = vmatpush1.bf16.msra.mxu1 %v2861_v53 }
 0x281   : > { %2548 = vmatmul.mubr.msk.bf16.vlgmr.msra.gmra.mrb[40].mxu0 %vm1356_vm1, %v3432_v20 }
 0x282   : > { %2550 = vmatmul.mubr.msk.bf16.vlgmr.msra.gmra.mrb[40].mxu1 %vm1356_vm1, %v3432_v20  ;;  %1799 = vmatprep.mubr.bf16.mxu0 %v2990_v17 }
 0x283   : > { %1852 = vmatprep.mubr.bf16.mxu1 %v2990_v17 }
 0x289   : > { %2549 = vmatmul.mubr.msk.bf16.gmra.mrb[44].mxu0 %vm1356_vm1, %v3443_v22 }
 0x28a   : > { %2551 = vmatmul.mubr.msk.bf16.gmra.mrb[44].mxu1 %vm1356_vm1, %v3443_v22  ;;  %1971 = vmatprep.mubr.bf16.mxu0 %v2990_v17 }
 0x28b   : > { %2024 = vmatprep.mubr.bf16.mxu1 %v2990_v17 }
 0x315   : > { %v1685_v10 = vpop.f32.mrb[32].mxu0 }
 0x316   : > { %v1738_v54 = vpop.f32.mrb[32].mxu1  ;;  %v1687_v11 = vpop.f32.mrb[33].mxu0  ;;  %v1686_v13 = vadd.f32 %v1685_v10, %v3479_v8 }
 0x317   : > { %v1740_v56 = vpop.f32.mrb[33].mxu1  ;;  %v1689_v12 = vpop.f32.mrb[34].mxu0  ;;  %v1739_v19 = vadd.f32 %v1738_v54, %v3479_v8  ;;  %v1688_v20 = vadd.f32 %v1687_v11, %v3479_v8 }
 0x318   : > { %v1690_v15 = vadd.f32 %v1689_v12, %v3481_v9  ;;  %v1742_v16 = vpop.f32.mrb[34].mxu1  ;;  %v1691_v18 = vpop.f32.mrb[35].mxu0  ;;  %v1741_v24 = vadd.f32 %v1740_v56, %v3479_v8 }
 0x319   : > { %v1743_v21 = vadd.f32 %v1742_v16, %v3481_v9  ;;  %v1692_v22 = vadd.f32 %v1691_v18, %v3481_v9  ;;  %v1744_v23 = vpop.f32.mrb[35].mxu1 }
 0x31a   : > { %v1863_v25 = vpack.c.bf16 %v1690_v15, %v1686_v13  ;;  %v1745_v26 = vadd.f32 %v1744_v23, %v3481_v9 }
 0x31b   : > { %v1865_v27 = vpack.c.bf16 %v1743_v21, %v1739_v19  ;;  %v1864_v28 = vpack.c.bf16 %v1692_v22, %v1688_v20 }
 0x31c   : > { %v1866_v29 = vpack.c.bf16 %v1745_v26, %v1741_v24  ;;  %2862 = vtanh.bf16 %v1863_v25 }
 0x31d   : > { %v1695_v32 = vpop.f32.mrb[36].mxu0  ;;  %2864 = vtanh.bf16 %v1864_v28 }
 0x31e   : > { %v1748_v33 = vpop.f32.mrb[36].mxu1  ;;  %v1697_v34 = vpop.f32.mrb[37].mxu0  ;;  %2866 = vtanh.bf16 %v1866_v29  ;;  %v1696_v37 = vadd.f32 %v1695_v32, %v3491_v55 }
 0x31f   : > { %v1750_v35 = vpop.f32.mrb[37].mxu1  ;;  %v1699_v36 = vpop.f32.mrb[38].mxu0  ;;  %2868 = vtanh.bf16 %v1865_v27  ;;  %v1749_v41 = vadd.f32 %v1748_v33, %v3491_v55  ;;  %v1698_v42 = vadd.f32 %v1697_v34, %v3491_v55 }
 0x320   : > { %v1700_v38 = vadd.f32 %v1699_v36, %v3493_v14  ;;  %v1752_v39 = vpop.f32.mrb[38].mxu1  ;;  %v1701_v40 = vpop.f32.mrb[39].mxu0  ;;  %v1751_v46 = vadd.f32 %v1750_v35, %v3491_v55 }
 0x321   : > { %v1753_v43 = vadd.f32 %v1752_v39, %v3493_v14  ;;  %v1702_v44 = vadd.f32 %v1701_v40, %v3493_v14  ;;  %v1754_v45 = vpop.f32.mrb[39].mxu1 }
 0x322   : > { %v1871_v47 = vpack.c.bf16 %v1700_v38, %v1696_v37  ;;  %v1755_v48 = vadd.f32 %v1754_v45, %v3493_v14 }
 0x323   : > { %v1873_v49 = vpack.c.bf16 %v1753_v43, %v1749_v41  ;;  %v1872_v30 = vpack.c.bf16 %v1702_v44, %v1698_v42 }
 0x324   : > { %v1874_v50 = vpack.c.bf16 %v1755_v48, %v1751_v46  ;;  %2870 = vtanh.bf16 %v1871_v47  ;;  %v3553_v47 = vpop.permute.xlu0 %1905  ;;  %v3555_v48 = vpop.permute.xlu1 %1910 }
 0x325   : > { %2872 = vtanh.bf16 %v1872_v30 }
 0x326   : > { %2874 = vtanh.bf16 %v1874_v50 }
 0x327   : > { %v2863_v31 = vpop.eup %2862  ;;  %2876 = vtanh.bf16 %v1873_v49 }
 0x328   : > { %v2865_v52 = vpop.eup %2864 }
 0x329   : > { %v2867_v0 = vpop.eup %2866  ;;  %1939 = vmatprep.subr.bf16.mxu0 %v2865_v52 }
 0x32a   : > { %v2869_v58 = vpop.eup %2868  ;;  %1992 = vmatprep.subr.bf16.mxu1 %v2867_v0  ;;  %1940 = vmatpush1.bf16.msra.mxu0 %v2863_v31 }
 0x32b   : > { %1993 = vmatpush1.bf16.msra.mxu1 %v2869_v58 }
 0x32f   : > { %v2871_v59 = vpop.eup %2870 }
 0x330   : > { %v2873_v60 = vpop.eup %2872 }
 0x331   : > { %v2875_v61 = vpop.eup %2874  ;;  %1941 = vmatprep.subr.bf16.mxu0 %v2873_v60 }
 0x332   : > { %v2877_v63 = vpop.eup %2876  ;;  %1994 = vmatprep.subr.bf16.mxu1 %v2875_v61  ;;  %1942 = vmatpush1.bf16.msra.mxu0 %v2871_v59 }
 0x333   : > { %1995 = vmatpush1.bf16.msra.mxu1 %v2877_v63 }
 0x335   : > { %2554 = vmatmul.mubr.msk.bf16.vlgmr.msra.gmra.mrb[48].mxu0 %vm1356_vm1, %v3506_v62 }
 0x336   : > { %2556 = vmatmul.mubr.msk.bf16.vlgmr.msra.gmra.mrb[48].mxu1 %vm1356_vm1, %v3506_v62  ;;  %1981 = vmatprep.mubr.bf16.mxu0 %v2990_v17 }
 0x337   : > { %2034 = vmatprep.mubr.bf16.mxu1 %v2990_v17 }
 0x33d   : > { %2555 = vmatmul.mubr.msk.bf16.gmra.mrb[52].mxu0 %vm1356_vm1, %v3517_v57 }
 0x33e   : > { %2557 = vmatmul.mubr.msk.bf16.gmra.mrb[52].mxu1 %vm1356_vm1, %v3517_v57  ;;  %2077 = vmatprep.mubr.bf16.mxu0 %v2990_v17 }
 0x33f   : > { %2130 = vmatprep.mubr.bf16.mxu1 %v2990_v17 }
 0x354   : > { %v1791_v1 = vpop.f32.mrb[40].mxu0 }
 0x355   : > { %v1844_v2 = vpop.f32.mrb[40].mxu1  ;;  %v1793_v3 = vpop.f32.mrb[41].mxu0  ;;  %v1792_v6 = vadd.f32 %v1791_v1, %v3479_v8 }
 0x356   : > { %v1846_v4 = vpop.f32.mrb[41].mxu1  ;;  %v1795_v5 = vpop.f32.mrb[42].mxu0  ;;  %v1845_v10 = vadd.f32 %v1844_v2, %v3479_v8  ;;  %v1794_v54 = vadd.f32 %v1793_v3, %v3479_v8 }
 0x357   : > { %v1796_v51 = vadd.f32 %v1795_v5, %v3481_v9  ;;  %v1848_v7 = vpop.f32.mrb[42].mxu1  ;;  %v1797_v53 = vpop.f32.mrb[43].mxu0  ;;  %v1847_v13 = vadd.f32 %v1846_v4, %v3479_v8 }
 0x358   : > { %v1849_v11 = vadd.f32 %v1848_v7, %v3481_v9  ;;  %v1798_v56 = vadd.f32 %v1797_v53, %v3481_v9  ;;  %v1850_v12 = vpop.f32.mrb[43].mxu1  ;;  %v3567_v53 = vpop.permute.xlu1 %1920 }
 0x359   : > { %v1867_v15 = vpack.c.bf16 %v1796_v51, %v1792_v6  ;;  %v1851_v16 = vadd.f32 %v1850_v12, %v3481_v9  ;;  %v3565_v51 = vpop.permute.xlu0 %1915 }
 0x35a   : > { %v1869_v18 = vpack.c.bf16 %v1849_v11, %v1845_v10  ;;  %v1868_v19 = vpack.c.bf16 %v1798_v56, %v1794_v54 }
 0x35b   : > { %v1870_v20 = vpack.c.bf16 %v1851_v16, %v1847_v13  ;;  %2878 = vtanh.bf16 %v1867_v15 }
 0x35c   : > { %v1801_v21 = vpop.f32.mrb[44].mxu0  ;;  %2880 = vtanh.bf16 %v1868_v19 }
 0x35d   : > { %v1854_v22 = vpop.f32.mrb[44].mxu1  ;;  %v1803_v23 = vpop.f32.mrb[45].mxu0  ;;  %2882 = vtanh.bf16 %v1870_v20  ;;  %v1802_v26 = vadd.f32 %v1801_v21, %v3491_v55 }
 0x35e   : > { %v1856_v24 = vpop.f32.mrb[45].mxu1  ;;  %v1805_v25 = vpop.f32.mrb[46].mxu0  ;;  %2884 = vtanh.bf16 %v1869_v18  ;;  %v1855_v9 = vadd.f32 %v1854_v22, %v3491_v55  ;;  %v1804_v29 = vadd.f32 %v1803_v23, %v3491_v55 }
 0x35f   : > { %v1806_v27 = vadd.f32 %v1805_v25, %v3493_v14  ;;  %v1858_v8 = vpop.f32.mrb[46].mxu1  ;;  %v1807_v28 = vpop.f32.mrb[47].mxu0  ;;  %v1857_v35 = vadd.f32 %v1856_v24, %v3491_v55 }
 0x360   : > { %v1859_v32 = vadd.f32 %v1858_v8, %v3493_v14  ;;  %v1808_v33 = vadd.f32 %v1807_v28, %v3493_v14  ;;  %v1860_v34 = vpop.f32.mrb[47].mxu1 }
 0x361   : > { %v1875_v36 = vpack.c.bf16 %v1806_v27, %v1802_v26  ;;  %v1861_v37 = vadd.f32 %v1860_v34, %v3493_v14 }
 0x362   : > { %v1877_v38 = vpack.c.bf16 %v1859_v32, %v1855_v9  ;;  %v1876_v39 = vpack.c.bf16 %v1808_v33, %v1804_v29 }
 0x363   : > { %v1878_v40 = vpack.c.bf16 %v1861_v37, %v1857_v35  ;;  %2886 = vtanh.bf16 %v1875_v36 }
 0x364   : > { %2888 = vtanh.bf16 %v1876_v39 }
 0x365   : > { %2890 = vtanh.bf16 %v1878_v40 }
 0x366   : > { %v2879_v41 = vpop.eup %2878  ;;  %2892 = vtanh.bf16 %v1877_v38  ;;  %v3580_v38 = vld [vmem:[%s3668_s9] sm:$0x3] }
 0x367   : > { %v2881_v42 = vpop.eup %2880 }
 0x368   : > { %v2883_v43 = vpop.eup %2882  ;;  %2045 = vmatprep.subr.bf16.mxu0 %v2881_v42 }
 0x369   : > { %v2885_v44 = vpop.eup %2884  ;;  %2098 = vmatprep.subr.bf16.mxu1 %v2883_v43  ;;  %2046 = vmatpush1.bf16.msra.mxu0 %v2879_v41 }
 0x36a   : > { %2099 = vmatpush1.bf16.msra.mxu1 %v2885_v44 }
 0x36e   : > { %v2887_v45 = vpop.eup %2886 }
 0x36f   : > { %v2889_v55 = vpop.eup %2888 }
 0x370   : > { %v2891_v46 = vpop.eup %2890  ;;  %2047 = vmatprep.subr.bf16.mxu0 %v2889_v55 }
 0x371   : > { %v2893_v14 = vpop.eup %2892  ;;  %2100 = vmatprep.subr.bf16.mxu1 %v2891_v46  ;;  %2048 = vmatpush1.bf16.msra.mxu0 %v2887_v45 }
 0x372   : > { %2101 = vmatpush1.bf16.msra.mxu1 %v2893_v14 }
 0x374   : > { %2558 = vmatmul.mubr.msk.bf16.vlgmr.msra.gmra.mrb[56].mxu0 %vm1356_vm1, %v3506_v62 }
 0x375   : > { %2560 = vmatmul.mubr.msk.bf16.vlgmr.msra.gmra.mrb[56].mxu1 %vm1356_vm1, %v3506_v62  ;;  %2087 = vmatprep.mubr.bf16.mxu0 %v2990_v17 }
 0x376   : > { %2140 = vmatprep.mubr.bf16.mxu1 %v2990_v17 }
 0x37c   : > { %2559 = vmatmul.mubr.msk.bf16.gmra.mrb[60].mxu0 %vm1356_vm1, %v3517_v57 }
 0x37d   : > { %2561 = vmatmul.mubr.msk.bf16.gmra.mrb[60].mxu1 %vm1356_vm1, %v3517_v57  ;;  %2225 = vmatprep.mubr.bf16.mxu0 %v2990_v17 }
 0x37e   : > { %2266 = vmatprep.mubr.bf16.mxu1 %v2990_v17 }
 0x408   : > { %v1973_v49 = vpop.f32.mrb[48].mxu0 }
 0x409   : > { %v2026_v30 = vpop.f32.mrb[48].mxu1  ;;  %v1975_v50 = vpop.f32.mrb[49].mxu0  ;;  %v1974_v0 = vadd.f32 %v1973_v49, %v3553_v47 }
 0x40a   : > { %v2028_v31 = vpop.f32.mrb[49].mxu1  ;;  %v1977_v52 = vpop.f32.mrb[50].mxu0  ;;  %v2027_v61 = vadd.f32 %v2026_v30, %v3553_v47  ;;  %v1976_v62 = vadd.f32 %v1975_v50, %v3553_v47 }
 0x40b   : > { %v1978_v58 = vadd.f32 %v1977_v52, %v3555_v48  ;;  %v2030_v59 = vpop.f32.mrb[50].mxu1  ;;  %v1979_v60 = vpop.f32.mrb[51].mxu0  ;;  %v2029_v2 = vadd.f32 %v2028_v31, %v3553_v47 }
 0x40c   : > { %v2031_v63 = vadd.f32 %v2030_v59, %v3555_v48  ;;  %v1980_v57 = vadd.f32 %v1979_v60, %v3555_v48  ;;  %v2032_v1 = vpop.f32.mrb[51].mxu1 }
 0x40d   : > { %v2151_v3 = vpack.c.bf16 %v1978_v58, %v1974_v0  ;;  %v2033_v4 = vadd.f32 %v2032_v1, %v3555_v48 }
 0x40e   : > { %v2153_v5 = vpack.c.bf16 %v2031_v63, %v2027_v61  ;;  %v2152_v6 = vpack.c.bf16 %v1980_v57, %v1976_v62 }
 0x40f   : > { %v2154_v7 = vpack.c.bf16 %v2033_v4, %v2029_v2  ;;  %2894 = vtanh.bf16 %v2151_v3 }
 0x410   : > { %v1983_v10 = vpop.f32.mrb[52].mxu0  ;;  %2896 = vtanh.bf16 %v2152_v6 }
 0x411   : > { %v2036_v54 = vpop.f32.mrb[52].mxu1  ;;  %v1985_v11 = vpop.f32.mrb[53].mxu0  ;;  %2898 = vtanh.bf16 %v2154_v7  ;;  %v1984_v13 = vadd.f32 %v1983_v10, %v3565_v51 }
 0x412   : > { %v2038_v56 = vpop.f32.mrb[53].mxu1  ;;  %v1987_v12 = vpop.f32.mrb[54].mxu0  ;;  %2900 = vtanh.bf16 %v2153_v5  ;;  %v2037_v19 = vadd.f32 %v2036_v54, %v3565_v51  ;;  %v1986_v20 = vadd.f32 %v1985_v11, %v3565_v51 }
 0x413   : > { %v1988_v15 = vadd.f32 %v1987_v12, %v3567_v53  ;;  %v2040_v16 = vpop.f32.mrb[54].mxu1  ;;  %v1989_v18 = vpop.f32.mrb[55].mxu0  ;;  %v2039_v24 = vadd.f32 %v2038_v56, %v3565_v51 }
 0x414   : > { %v2041_v21 = vadd.f32 %v2040_v16, %v3567_v53  ;;  %v1990_v22 = vadd.f32 %v1989_v18, %v3567_v53  ;;  %v2042_v23 = vpop.f32.mrb[55].mxu1 }
 0x415   : > { %v2159_v25 = vpack.c.bf16 %v1988_v15, %v1984_v13  ;;  %v2043_v26 = vadd.f32 %v2042_v23, %v3567_v53  ;;  %v2188_v23 = vpop.permute.xlu0 %2187 }
 0x416   : > { %v2161_v27 = vpack.c.bf16 %v2041_v21, %v2037_v19  ;;  %v2160_v8 = vpack.c.bf16 %v1990_v22, %v1986_v20 }
 0x417   : > { %v2162_v28 = vpack.c.bf16 %v2043_v26, %v2039_v24  ;;  %2902 = vtanh.bf16 %v2159_v25 }
 0x418   : > { %2904 = vtanh.bf16 %v2160_v8 }
 0x419   : > { %2906 = vtanh.bf16 %v2162_v28 }
 0x41a   : > { %v2895_v9 = vpop.eup %2894  ;;  %2908 = vtanh.bf16 %v2161_v27 }
 0x41b   : > { %v2897_v29 = vpop.eup %2896 }
 0x41c   : > { %v2899_v32 = vpop.eup %2898  ;;  %2193 = vmatprep.subr.bf16.mxu0 %v2897_v29 }
 0x41d   : > { %v2901_v33 = vpop.eup %2900  ;;  %2234 = vmatprep.subr.bf16.mxu1 %v2899_v32  ;;  %2194 = vmatpush1.bf16.msra.mxu0 %v2895_v9 }
 0x41e   : > { %2235 = vmatpush1.bf16.msra.mxu1 %v2901_v33 }
 0x422   : > { %v2903_v34 = vpop.eup %2902 }
 0x423   : > { %v2905_v35 = vpop.eup %2904 }
 0x424   : > { %v2907_v36 = vpop.eup %2906  ;;  %2195 = vmatprep.subr.bf16.mxu0 %v2905_v35 }
 0x425   : > { %v2909_v37 = vpop.eup %2908  ;;  %2236 = vmatprep.subr.bf16.mxu1 %v2907_v36  ;;  %2196 = vmatpush1.bf16.msra.mxu0 %v2903_v34 }
 0x426   : > { %2237 = vmatpush1.bf16.msra.mxu1 %v2909_v37 }
 0x428   : > { %2562 = vmatmul.mubr.msk.bf16.vlgmr.msra.gmra.mrb[64].mxu0 %vm1356_vm1, %v3580_v38 }
 0x429   : > { %2563 = vmatmul.mubr.msk.bf16.vlgmr.msra.gmra.mrb[64].mxu1 %vm1356_vm1, %v3580_v38  ;;  %2307 = vmatprep.mubr.bf16.mxu0 %v2990_v17 }
 0x42a   : > { %2348 = vmatprep.mubr.bf16.mxu1 %v2990_v17 }
 0x447   : > { %v2079_v39 = vpop.f32.mrb[56].mxu0 }
 0x448   : > { %v2132_v40 = vpop.f32.mrb[56].mxu1  ;;  %v2081_v41 = vpop.f32.mrb[57].mxu0  ;;  %v2080_v44 = vadd.f32 %v2079_v39, %v3553_v47 }
 0x449   : > { %v2134_v42 = vpop.f32.mrb[57].mxu1  ;;  %v2083_v43 = vpop.f32.mrb[58].mxu0  ;;  %v2133_v14 = vadd.f32 %v2132_v40, %v3553_v47  ;;  %v2082_v49 = vadd.f32 %v2081_v41, %v3553_v47 }
 0x44a   : > { %v2084_v45 = vadd.f32 %v2083_v43, %v3555_v48  ;;  %v2136_v55 = vpop.f32.mrb[58].mxu1  ;;  %v2085_v46 = vpop.f32.mrb[59].mxu0  ;;  %v2135_v31 = vadd.f32 %v2134_v42, %v3553_v47 }
 0x44b   : > { %v2137_v30 = vadd.f32 %v2136_v55, %v3555_v48  ;;  %v2086_v50 = vadd.f32 %v2085_v46, %v3555_v48  ;;  %v2138_v17 = vpop.f32.mrb[59].mxu1 }
 0x44c   : > { %v2155_v52 = vpack.c.bf16 %v2084_v45, %v2080_v44  ;;  %v2139_v0 = vadd.f32 %v2138_v17, %v3555_v48 }
 0x44d   : > { %v2157_v58 = vpack.c.bf16 %v2137_v30, %v2133_v14  ;;  %v2156_v59 = vpack.c.bf16 %v2086_v50, %v2082_v49 }
 0x44e   : > { %v2158_v60 = vpack.c.bf16 %v2139_v0, %v2135_v31  ;;  %2910 = vtanh.bf16 %v2155_v52 }
 0x44f   : > { %v2089_v61 = vpop.f32.mrb[60].mxu0  ;;  %2912 = vtanh.bf16 %v2156_v59 }
 0x450   : > { %v2142_v62 = vpop.f32.mrb[60].mxu1  ;;  %v2091_v63 = vpop.f32.mrb[61].mxu0  ;;  %2914 = vtanh.bf16 %v2158_v60  ;;  %v2090_v2 = vadd.f32 %v2089_v61, %v3565_v51 }
 0x451   : > { %v2144_v57 = vpop.f32.mrb[61].mxu1  ;;  %v2093_v1 = vpop.f32.mrb[62].mxu0  ;;  %2916 = vtanh.bf16 %v2157_v58  ;;  %v2143_v48 = vadd.f32 %v2142_v62, %v3565_v51  ;;  %v2092_v5 = vadd.f32 %v2091_v63, %v3565_v51 }
 0x452   : > { %v2094_v3 = vadd.f32 %v2093_v1, %v3567_v53  ;;  %v2146_v47 = vpop.f32.mrb[62].mxu1  ;;  %v2095_v4 = vpop.f32.mrb[63].mxu0  ;;  %v2145_v54 = vadd.f32 %v2144_v57, %v3565_v51 }
 0x453   : > { %v2147_v6 = vadd.f32 %v2146_v47, %v3567_v53  ;;  %v2096_v7 = vadd.f32 %v2095_v4, %v3567_v53  ;;  %v2148_v10 = vpop.f32.mrb[63].mxu1 }
 0x454   : > { %v2163_v11 = vpack.c.bf16 %v2094_v3, %v2090_v2  ;;  %v2149_v56 = vadd.f32 %v2148_v10, %v3567_v53 }
 0x455   : > { %v2165_v12 = vpack.c.bf16 %v2147_v6, %v2143_v48  ;;  %v2164_v13 = vpack.c.bf16 %v2096_v7, %v2092_v5 }
 0x456   : > { %v2166_v15 = vpack.c.bf16 %v2149_v56, %v2145_v54  ;;  %2918 = vtanh.bf16 %v2163_v11 }
 0x457   : > { %2920 = vtanh.bf16 %v2164_v13 }
 0x458   : > { %2922 = vtanh.bf16 %v2166_v15 }
 0x459   : > { %v2911_v16 = vpop.eup %2910  ;;  %2924 = vtanh.bf16 %v2165_v12 }
 0x45a   : > { %v2913_v18 = vpop.eup %2912 }
 0x45b   : > { %v2915_v19 = vpop.eup %2914  ;;  %2275 = vmatprep.subr.bf16.mxu0 %v2913_v18 }
 0x45c   : > { %v2917_v20 = vpop.eup %2916  ;;  %2316 = vmatprep.subr.bf16.mxu1 %v2915_v19  ;;  %2276 = vmatpush1.bf16.msra.mxu0 %v2911_v16 }
 0x45d   : > { %2317 = vmatpush1.bf16.msra.mxu1 %v2917_v20 }
 0x461   : > { %v2919_v51 = vpop.eup %2918 }
 0x462   : > { %v2921_v21 = vpop.eup %2920 }
 0x463   : > { %v2923_v53 = vpop.eup %2922  ;;  %2277 = vmatprep.subr.bf16.mxu0 %v2921_v21 }
 0x464   : > { %v2925_v22 = vpop.eup %2924  ;;  %2318 = vmatprep.subr.bf16.mxu1 %v2923_v53  ;;  %2278 = vmatpush1.bf16.msra.mxu0 %v2919_v51 }
 0x465   : > { %2319 = vmatpush1.bf16.msra.mxu1 %v2925_v22 }
 0x467   : > { %2564 = vmatmul.mubr.msk.bf16.vlgmr.msra.gmra.mrb[68].mxu0 %vm1356_vm1, %v3580_v38 }
 0x468   : > { %2565 = vmatmul.mubr.msk.bf16.vlgmr.msra.gmra.mrb[68].mxu1 %vm1356_vm1, %v3580_v38 }
 0x4fb   : > { %v2227_v24 = vpop.f32.mrb[64].mxu0 }
 0x4fc   : > { %v2228_v25 = vadd.f32 %v2227_v24, %v2188_v23  ;;  %v2268_v26 = vpop.f32.mrb[64].mxu1  ;;  %v2229_v27 = vpop.f32.mrb[65].mxu0 }
 0x4fd   : > { %v2269_v8 = vadd.f32 %v2268_v26, %v2188_v23  ;;  %v2230_v28 = vadd.f32 %v2229_v27, %v2188_v23  ;;  %v2270_v9 = vpop.f32.mrb[65].mxu1  ;;  %v2231_v29 = vpop.f32.mrb[66].mxu0 }
 0x4fe   : > { %v2271_v32 = vadd.f32 %v2270_v9, %v2188_v23  ;;  %v2272_v33 = vpop.f32.mrb[66].mxu1  ;;  %v2232_v34 = vpop.f32.mrb[67].mxu0 }
 0x4ff   : > { %v2365_v35 = vcombine.low %v2228_v25, %v2230_v28  ;;  %v2273_v36 = vpop.f32.mrb[67].mxu1 }
 0x500   : > { %v2366_v37 = vcombine.low %v2269_v8, %v2271_v32 }
 0x501   : > { %2373 = vst [vmem:[%s380_s12] sm:$0xff] %v2365_v35 }
 0x502   : > { %2374 = vst [vmem:[%s380_s12 + $0x8] sm:$0xff] %v2366_v37 }
 0x53a   : > { %v2309_v38 = vpop.f32.mrb[68].mxu0 }
 0x53b   : > { %v2310_v39 = vadd.f32 %v2309_v38, %v2188_v23  ;;  %v2350_v40 = vpop.f32.mrb[68].mxu1  ;;  %v2311_v41 = vpop.f32.mrb[69].mxu0 }
 0x53c   : > { %v2351_v42 = vadd.f32 %v2350_v40, %v2188_v23  ;;  %v2312_v43 = vadd.f32 %v2311_v41, %v2188_v23  ;;  %v2352_v44 = vpop.f32.mrb[69].mxu1  ;;  %v2313_v45 = vpop.f32.mrb[70].mxu0 }
 0x53d   : > { %v2353_v55 = vadd.f32 %v2352_v44, %v2188_v23  ;;  %v2354_v46 = vpop.f32.mrb[70].mxu1  ;;  %v2314_v14 = vpop.f32.mrb[71].mxu0 }
 0x53e   : > { %v2367_v49 = vcombine.low %v2310_v39, %v2312_v43  ;;  %v2355_v30 = vpop.f32.mrb[71].mxu1 }
 0x53f   : > { %v2368_v50 = vcombine.low %v2351_v42, %v2353_v55 }
 0x540   : > { %2375 = vst [vmem:[%s380_s12 + $0x10] sm:$0xff] %v2367_v49 }
 0x541   : > { %2376 = vst [vmem:[%s380_s12 + $0x18] sm:$0xff] %v2368_v50 }
 0x542   : > { %2939 = shalt.err (!%p2936_p3)
}
 0x543   : > { %s2940_s29 = scalar_lea.hbm %s3615_s22, 512  ;;  %s2944_s16 = scalar_lea.hbm %s3670_s11, 1024 }
 0x544   : > { %p2941_p4 = scmp.ne.s32.totalorder %s3615_s22, %s2940_s29  ;;  %p2945_p9 = scmp.lt.u32.totalorder %s3615_s22, %s3670_s11 }
 0x545   : > { %p2946_p10 = scmp.lt.u32.totalorder %s2944_s16, %s2940_s29  ;;  %p2948_p12 = scmp.lt.u32.totalorder %s2940_s29, %s3615_s22 }
 0x546   : > { %p2942_p7 = pnand %p2941_p4, %p3090_p5 }
 0x547   : > { %p2947_p11 = por %p2946_p10, %p2945_p9 }
 0x548   : > { %p2943_p8 = pneg %p2942_p7 }
 0x549   : > { %p2949_p13 = por %p2948_p12, %p2947_p11 }
 0x54b   : > { %p2950_p0 = pnand %p2949_p13, %p2943_p8 }
 0x54d   : > { %2953 = shalt.err (!%p2950_p0)
}
 0x54e   : > { %2684 = dma.vmem_to_hbm [thread:$0]  (%p3090_p5), %s3617_s14, 512, %s3615_s22, %s2378_s21  }
 0x54f PF: > { %p2690_p1 = scmp.ge.s32.totalorder %s2988_s20, 2  ;;  %s2404_s24 = sand.u32 1, %s2976_s17  }
 0x550   : > { %s2405_s15 = scalar_lea.sflag [#allocation3], %s2404_s24 }
 0x551   : > { %p2687_p2 = pnand %p2690_p1, %p3094_p6 }
 0x553   : > { %2971 = dma.done.wait (!%p2687_p2), %s2405_s15, 512  }
 0x554   : > { %2973 = vsyncadd (!%p2687_p2), %s2405_s15, 4294966784  ;;  %p21_p3 = scmp.ge.s32.totalorder %s3077_s23, 4   ;;  %s3673_s17 = smov %s2980_s18 }
 0x555   : > { %s3674_s18 = smov %s2984_s19  ;;  %s3675_s19 = smov %s3088_s26 }
 0x556   : > { %s3676_s20 = smov %s3077_s23  ;;  %23 = sbr.rel (!%p21_p3) target bundleno = 3 (0x3), region = 99 }
 0x55d   :  { %2410 = vsyncpa [#allocation3], 1 }
 0x55e   :  { %2412 = vsyncpa [#allocation3 + $0x1], 1 }

</bundles_post_ra>
